<compile_context>
chip_gen: v7x
topology: tpu7x:2x2x1
jax: 0.10.0
libtpu: 0.0.40
codegen_flags: <defaults>
</compile_context>

<pallas_src>
import numpy as np
import jax
import jax.numpy as jnp
from jax import lax
from jax.experimental import pallas as pl
from jax.experimental.pallas import tpu as pltpu


# -----------------------------------------------------------------------------
# Pallas kernel factory: one grid step == one ResidualAttnBlock over the whole batch.
# Grid axis = stack index (sequential); the activation is carried in y_ref (output
# block resident across the whole grid).
# -----------------------------------------------------------------------------
def _make_kernel(B, C, Ch, H, W):
  HW = H * W
  N = B * HW

  def kernel(x_ref,                  # (C, N)        input activation (lane-dense)
             masks_ref,              # (8, N)        off-centre 3x3 boundary masks
             avgsel_ref,             # (N, B)        per-image mean selector (1/HW)
             expand_ref,             # (B, N)        per-image 0/1 expansion matrix
             w1_ref, b1_ref,         # (Ch, C), (Ch, 1)     conv_expand (1x1) + BN folded
             w2_ref, b2_ref,         # (Ch, 9*Ch), (Ch, 1)  conv_main (3x3) + BN folded
             g1_ref, g2_ref,         # (2R, 2Ch), (Ch, 2R)  fused channel-gate MLP
             kmat_ref,               # (2*HW, HW) bf16      7x7 conv as matrix (BN folded)
             bs_ref,                 # (S, 1) in SMEM       spatial-conv BN shift
             w3_ref, b3_ref,         # (C, Ch), (C, 1)      conv_compress (1x1) + BN folded
             y_ref,                  # (C, N)               output == activation carry
             im2col_ref):            # scratch (9*Ch, N)    streamed im2col taps
    s = pl.program_id(0)

    @pl.when(s == 0)
    def _():
      y_ref[...] = x_ref[...]

    xcur = y_ref[...]                                          # (C, N)

    # ---- conv_expand (1x1) + BN(folded) + ReLU ----
    h1 = jnp.dot(w1_ref[...], xcur,
                 preferred_element_type=jnp.float32) + b1_ref[...]
    h1 = jnp.maximum(h1, 0.0)                                  # (Ch, N)

    # ---- conv_main (3x3, pad=1) + BN(folded) + ReLU ----
    # Stream the 9 taps (lane rolls * precomputed boundary masks) straight into the
    # persistent im2col scratch, then one fused K=9*Ch MXU matmul.
    tap_m = 0
    for ky in range(3):
      for kx in range(3):
        dy, dx = ky - 1, kx - 1
        idx = ky * 3 + kx
        if dy == 0 and dx == 0:
          im2col_ref[idx * Ch:(idx + 1) * Ch, :] = h1
          continue
        shifted = jnp.roll(h1, -(dy * W + dx), axis=1)
        im2col_ref[idx * Ch:(idx + 1) * Ch, :] = shifted * masks_ref[tap_m:tap_m + 1, :]
        tap_m += 1
    h2 = jnp.dot(w2_ref[...], im2col_ref[...],
                 preferred_element_type=jnp.float32) + b2_ref[...]
    h2 = jnp.maximum(h2, 0.0)                                  # (Ch, N)

    # ---- channel gate: per-image avg (MXU) / max (XLU) pool + fused blockdiag MLP ----
    avg = jnp.dot(h2, avgsel_ref[...],
                  preferred_element_type=jnp.float32)          # (Ch, B)
    mx = jnp.concatenate(
        [jnp.max(h2[:, b * HW:(b + 1) * HW], axis=1, keepdims=True)
         for b in range(B)], axis=1)                           # (Ch, B)
    pooled = jnp.concatenate([avg, mx], axis=0)                # (2*Ch, B)
    hidden = jnp.maximum(
        jnp.dot(g1_ref[...], pooled, preferred_element_type=jnp.float32), 0.0)
    logits = jnp.dot(g2_ref[...], hidden,
                     preferred_element_type=jnp.float32)       # (Ch, B)
    ch_mask = jax.nn.sigmoid(logits)                           # (Ch, B)
    cm_full = jnp.dot(ch_mask, expand_ref[...],
                      preferred_element_type=jnp.float32)      # (Ch, N)
    outc = h2 * cm_full

    # ---- spatial gate: 7x7 SAME conv on [mean,max] maps, one batched matmul ----
    mean_map = jnp.mean(outc, axis=0, keepdims=True)           # (1, N)
    max_map = jnp.max(outc, axis=0, keepdims=True)             # (1, N)
    sp_rows = []
    for b in range(B):
      lo = b * HW
      sp_rows.append(jnp.concatenate(
          [mean_map[:, lo:lo + HW], max_map[:, lo:lo + HW]], axis=1))
    sp_in = jnp.concatenate(sp_rows, axis=0).astype(jnp.bfloat16)   # (B, 2*HW)
    sres = jnp.dot(sp_in, kmat_ref[...],
                   preferred_element_type=jnp.float32)              # (B, HW)
    smask = jax.nn.sigmoid(
        jnp.concatenate([sres[b:b + 1, :] for b in range(B)], axis=1)
        + bs_ref[s, 0])                                             # (1, N)
    outs = outc * smask

    # ---- conv_compress (1x1) + BN(folded) + residual + ReLU ----
    y = jnp.dot(w3_ref[...], outs,
                preferred_element_type=jnp.float32) + b3_ref[...] + xcur
    y_ref[...] = jnp.maximum(y, 0.0)

  return kernel


# -----------------------------------------------------------------------------
# Wrapper: whole N2DSRAB forward in ONE pallas_call (grid over stacks).
# x: (B, C, H, W) NCHW -> (B, C, H, W) NCHW.
# -----------------------------------------------------------------------------
_KERNEL_PARAM_KEYS = ("w1", "b1", "w2", "b2", "g1", "g2", "kmat", "bs", "w3", "b3")


def _build_tap_masks(B, H, W):
  """(8, B*H*W) f32 validity masks for the 8 off-centre 3x3 taps (flat lane layout)."""
  HW = H * W
  N = B * HW
  pix = np.arange(N) % HW
  row = pix // W
  col = pix % W
  masks = []
  for ky in range(3):
    for kx in range(3):
      dy, dx = ky - 1, kx - 1
      if dy == 0 and dx == 0:
        continue
      ok = ((row + dy >= 0) & (row + dy < H) &
            (col + dx >= 0) & (col + dx < W))
      masks.append(ok.astype(np.float32))
  return jnp.asarray(np.stack(masks, axis=0))


def n2dsrab_forward(x_nchw, params_list):
  B, C, H, W = x_nchw.shape
  HW = H * W
  N = B * HW
  S = len(params_list)
  Ch = params_list[0]["w1"].shape[0]
  R2 = params_list[0]["g2"].shape[1]   # == 2*R

  stacked = {k: jnp.stack([p[k] for p in params_list], axis=0)
             for k in _KERNEL_PARAM_KEYS}
  kmat_bf16 = stacked["kmat"].astype(jnp.bfloat16)     # dominant DMA -> bf16
  bs_smem = stacked["bs"].reshape(S, 1)                # (S, 1) scalar table (SMEM)

  # Grid-invariant constants, fetched once.
  masks = _build_tap_masks(B, H, W)                    # (8, N)
  expand_np = np.zeros((B, N), np.float32)
  for b in range(B):
    expand_np[b, b * HW:(b + 1) * HW] = 1.0
  expand = jnp.asarray(expand_np)                      # (B, N) 0/1
  avgsel = jnp.asarray(expand_np.T / HW)               # (N, B) per-image mean selector

  # NCHW -> lane-dense (C, B*H*W)
  x_flat = jnp.transpose(x_nchw, (1, 0, 2, 3)).reshape(C, N)

  kernel = _make_kernel(B, C, Ch, H, W)

  in_specs = [
      pl.BlockSpec((C, N), lambda s: (0, 0)),                     # x (fetched once)
      pl.BlockSpec((8, N), lambda s: (0, 0)),                     # tap masks
      pl.BlockSpec((N, B), lambda s: (0, 0)),                     # avg selector
      pl.BlockSpec((B, N), lambda s: (0, 0)),                     # expansion matrix
      pl.BlockSpec((None, Ch, C), lambda s: (s, 0, 0)),           # w1
      pl.BlockSpec((None, Ch, 1), lambda s: (s, 0, 0)),           # b1
      pl.BlockSpec((None, Ch, 9 * Ch), lambda s: (s, 0, 0)),      # w2 (im2col weights)
      pl.BlockSpec((None, Ch, 1), lambda s: (s, 0, 0)),           # b2
      pl.BlockSpec((None, R2, 2 * Ch), lambda s: (s, 0, 0)),      # g1
      pl.BlockSpec((None, Ch, R2), lambda s: (s, 0, 0)),          # g2
      pl.BlockSpec((None, 2 * HW, HW), lambda s: (s, 0, 0)),      # kmat (bf16)
      pl.BlockSpec(memory_space=pltpu.MemorySpace.SMEM),          # bs (scalar table)
      pl.BlockSpec((None, C, Ch), lambda s: (s, 0, 0)),           # w3
      pl.BlockSpec((None, C, 1), lambda s: (s, 0, 0)),            # b3
  ]
  # Output block is resident across the stack axis and doubles as the carry.
  out_specs = pl.BlockSpec((C, N), lambda s: (0, 0))

  out_flat = pl.pallas_call(
      kernel,
      out_shape=jax.ShapeDtypeStruct((C, N), jnp.float32),
      grid=(S,),
      in_specs=in_specs,
      out_specs=out_specs,
      scratch_shapes=[pltpu.VMEM((9 * Ch, N), jnp.float32)],      # streamed im2col
      # Stack axis carries the activation sequentially -> "arbitrary".
      compiler_params=pltpu.CompilerParams(dimension_semantics=("arbitrary",)),
  )(x_flat, masks, avgsel, expand,
    stacked["w1"], stacked["b1"], stacked["w2"], stacked["b2"],
    stacked["g1"], stacked["g2"], kmat_bf16, bs_smem,
    stacked["w3"], stacked["b3"])

  return jnp.transpose(out_flat.reshape(C, B, H, W), (1, 0, 2, 3))


# -----------------------------------------------------------------------------
# Deterministic parameter construction (+ eval-mode BN folding).
# -----------------------------------------------------------------------------
def _build_spatial_conv_matrix(ws_np, H, W):
  """Full (2*HW, HW) matrix so that [mean_flat, max_flat] @ K == 7x7 SAME conv."""
  HW = H * W
  K = np.zeros((2 * HW, HW), np.float32)
  for h in range(H):
    for w in range(W):
      q = h * W + w
      for ky in range(7):
        for kx in range(7):
          hs, wsrc = h + ky - 3, w + kx - 3
          if 0 <= hs < H and 0 <= wsrc < W:
            p = hs * W + wsrc
            K[p, q] += ws_np[ky, kx, 0]          # mean channel
            K[HW + p, q] += ws_np[ky, kx, 1]     # max channel
  return jnp.asarray(K)


def make_block_params(key, in_channels, expansion, H, W):
  C = in_channels
  Ch = C * expansion
  R = max(1, Ch // 8)
  eps = 1e-5
  keys = iter(jax.random.split(key, 32))

  def nrm(shape, s=0.2):
    return jax.random.normal(next(keys), shape, jnp.float32) * s

  def bn_fold(n):
    gamma = 1.0 + nrm((n,), 0.1)
    beta = nrm((n,), 0.1)
    mean = nrm((n,), 0.1)
    var = 0.5 + jax.random.uniform(next(keys), (n,), jnp.float32)
    scale = gamma / jnp.sqrt(var + eps)
    shift = beta - mean * scale
    return scale, shift

  # conv_expand (Ch, C, 1, 1) + bias, BN(Ch)
  we, be = nrm((Ch, C)), nrm((Ch,))
  s1, sh1 = bn_fold(Ch)
  w1 = we * s1[:, None]                 # (Ch, C)
  b1 = (be * s1 + sh1)[:, None]         # (Ch, 1)

  # conv_main (Ch, Ch, 3, 3) + bias, BN(Ch) -> im2col weights (Ch, 9*Ch), k = ky*3+kx
  wm, bm = nrm((Ch, Ch, 3, 3)), nrm((Ch,))
  s2, sh2 = bn_fold(Ch)
  wmf = wm * s2[:, None, None, None]                    # (Cout, Cin, 3, 3)
  w2 = jnp.transpose(wmf, (0, 2, 3, 1)).reshape(Ch, 9 * Ch)   # [cout, ky, kx, cin]
  b2 = (bm * s2 + sh2)[:, None]

  # attention MLPs (Linear, no bias); fuse avg/max branches (blockdiag / concat)
  A1, A2 = nrm((R, Ch)), nrm((Ch, R))
  M1, M2 = nrm((R, Ch)), nrm((Ch, R))
  g1 = jnp.zeros((2 * R, 2 * Ch), jnp.float32)
  g1 = g1.at[:R, :Ch].set(A1).at[R:, Ch:].set(M1)       # (2R, 2Ch)
  g2 = jnp.concatenate([A2, M2], axis=1)                # (Ch, 2R)

  # spatial conv (1, 2, 7, 7), no bias, BN(1)
  wsp = nrm((1, 2, 7, 7))
  ss, shs = bn_fold(1)
  ws = jnp.transpose(wsp[0], (1, 2, 0)) * ss[0]         # (7, 7, 2), BN scale folded
  bs = jnp.reshape(shs, (1, 1))
  kmat = _build_spatial_conv_matrix(np.asarray(ws), H, W)   # (2*HW, HW)

  # conv_compress (C, Ch, 1, 1) + bias, BN(C)
  wc, bc = nrm((C, Ch)), nrm((C,))
  s3, sh3 = bn_fold(C)
  w3 = wc * s3[:, None]                 # (C, Ch)
  b3 = (bc * s3 + sh3)[:, None]         # (C, 1)

  return dict(w1=w1, b1=b1, w2=w2, b2=b2, g1=g1, g2=g2,
              kmat=kmat, bs=bs, w3=w3, b3=b3, ws=ws)


# -----------------------------------------------------------------------------
# Pure-JAX reference (same folded params) for a correctness check.
# -----------------------------------------------------------------------------
def _ref_block(x, p):   # x: (B, H, W, C) NHWC
  B, H, W, C = x.shape
  Ch = p["w1"].shape[0]
  R = p["g2"].shape[1] // 2
  hp = lax.Precision.HIGHEST

  h = jnp.einsum("bhwc,kc->bhwk", x, p["w1"], precision=hp) + p["b1"][:, 0]
  h = jnp.maximum(h, 0.0)

  w2 = p["w2"].reshape(Ch, 3, 3, Ch).transpose(1, 2, 3, 0)   # HWIO
  h2 = lax.conv_general_dilated(h, w2, (1, 1), "SAME",
                                dimension_numbers=("NHWC", "HWIO", "NHWC"),
                                precision=hp) + p["b2"][:, 0]
  h2 = jnp.maximum(h2, 0.0)

  avg = h2.mean((1, 2))
  mx = h2.max((1, 2))
  A1, M1 = p["g1"][:R, :Ch], p["g1"][R:, Ch:]
  A2, M2 = p["g2"][:, :R], p["g2"][:, R:]
  a = jnp.maximum(avg @ A1.T, 0.0) @ A2.T
  m = jnp.maximum(mx @ M1.T, 0.0) @ M2.T
  cm = jax.nn.sigmoid(a + m)[:, None, None, :]
  out = h2 * cm

  sp_in = jnp.concatenate([out.mean(-1, keepdims=True),
                           out.max(-1, keepdims=True)], axis=-1)
  ws = p["ws"].reshape(7, 7, 2, 1)
  sm = jax.nn.sigmoid(
      lax.conv_general_dilated(sp_in, ws, (1, 1), "SAME",
                               dimension_numbers=("NHWC", "HWIO", "NHWC"),
                               precision=hp) + p["bs"][0, 0])
  out = out * sm

  y = jnp.einsum("bhwk,ck->bhwc", out, p["w3"], precision=hp) + p["b3"][:, 0]
  return jnp.maximum(y + x, 0.0)


def _ref_forward(x_nchw, params_list):
  out = jnp.transpose(x_nchw, (0, 2, 3, 1))
  for p in params_list:
    out = _ref_block(out, p)
  return jnp.transpose(out, (0, 3, 1, 2))


# -----------------------------------------------------------------------------
if __name__ == "__main__":
  B, C, H, W = 2, 4, 16, 16
  expansion, num_stacks = 2, 2

  key = jax.random.PRNGKey(0)
  kx, *kblocks = jax.random.split(key, num_stacks + 1)
  x_nchw = jax.random.normal(kx, (B, C, H, W), jnp.float32)
  params = [make_block_params(k, C, expansion, H, W) for k in kblocks]

  out = n2dsrab_forward(x_nchw, params)
  out = jax.block_until_ready(out)

  ref = _ref_forward(x_nchw, params)
  np.testing.assert_allclose(np.asarray(out), np.asarray(ref), rtol=1e-2, atol=1e-2)

  print("KERNEL_OK")
</pallas_src>

<mosaic_0001>
module attributes {stable_mosaic.version = 11 : i64} {
  func.func @kernel(%arg0: i32, %arg1: memref<4x512xf32, #tpu.memory_space<vmem>>, %arg2: memref<8x512xf32, #tpu.memory_space<vmem>>, %arg3: memref<512x2xf32, #tpu.memory_space<vmem>>, %arg4: memref<2x512xf32, #tpu.memory_space<vmem>>, %arg5: memref<1x8x4xf32, #tpu.memory_space<vmem>>, %arg6: memref<1x8x1xf32, #tpu.memory_space<vmem>>, %arg7: memref<1x8x72xf32, #tpu.memory_space<vmem>>, %arg8: memref<1x8x1xf32, #tpu.memory_space<vmem>>, %arg9: memref<1x2x16xf32, #tpu.memory_space<vmem>>, %arg10: memref<1x8x2xf32, #tpu.memory_space<vmem>>, %arg11: memref<1x512x256xbf16, #tpu.memory_space<vmem>>, %arg12: memref<2x1xf32, #tpu.memory_space<smem>>, %arg13: memref<1x4x8xf32, #tpu.memory_space<vmem>>, %arg14: memref<1x4x1xf32, #tpu.memory_space<vmem>>, %arg15: memref<4x512xf32, #tpu.memory_space<vmem>>, %arg16: memref<72x512xf32, #tpu.memory_space<vmem>>) attributes {dimension_semantics = [#tpu.dimension_semantics<arbitrary>], iteration_bounds = array<i64: 2>, scalar_prefetch = 0 : i64, scratch_operands = 1 : i64, tpu.core_type = #tpu.core_type<tc>, window_params = [{pipeline_mode = #tpu.pipeline_mode<synchronous>, transform_indices = @transform_0, window_bounds = array<i64: 4, 512>}, {pipeline_mode = #tpu.pipeline_mode<synchronous>, transform_indices = @transform_1, window_bounds = array<i64: 8, 512>}, {pipeline_mode = #tpu.pipeline_mode<synchronous>, transform_indices = @transform_2, window_bounds = array<i64: 512, 2>}, {pipeline_mode = #tpu.pipeline_mode<synchronous>, transform_indices = @transform_3, window_bounds = array<i64: 2, 512>}, {transform_indices = @transform_4, window_bounds = array<i64: 1, 8, 4>}, {transform_indices = @transform_5, window_bounds = array<i64: 1, 8, 1>}, {transform_indices = @transform_6, window_bounds = array<i64: 1, 8, 72>}, {transform_indices = @transform_7, window_bounds = array<i64: 1, 8, 1>}, {transform_indices = @transform_8, window_bounds = array<i64: 1, 2, 16>}, {transform_indices = @transform_9, window_bounds = array<i64: 1, 8, 2>}, {transform_indices = @transform_10, window_bounds = array<i64: 1, 512, 256>}, {transform_indices = @transform_11, window_bounds = array<i64: 2, 1>}, {transform_indices = @transform_12, window_bounds = array<i64: 1, 4, 8>}, {transform_indices = @transform_13, window_bounds = array<i64: 1, 4, 1>}, {pipeline_mode = #tpu.pipeline_mode<synchronous>, transform_indices = @transform_14, window_bounds = array<i64: 4, 512>}]} {
    %c0_i32 = arith.constant 0 : i32
    %0 = arith.cmpi eq, %arg0, %c0_i32 : i32
    %1 = arith.extui %0 : i1 to i32
    %c0_i32_0 = arith.constant 0 : i32
    %2 = arith.cmpi ne, %1, %c0_i32_0 : i32
    scf.if %2 {
      %c0_75 = arith.constant 0 : index
      %c0_76 = arith.constant 0 : index
      %148 = vector.load %arg1[%c0_75, %c0_76] : memref<4x512xf32, #tpu.memory_space<vmem>>, vector<4x512xf32>
      %c0_77 = arith.constant 0 : index
      %c0_78 = arith.constant 0 : index
      %149 = vector.load %arg15[%c0_77, %c0_78] : memref<4x512xf32, #tpu.memory_space<vmem>>, vector<4x512xf32>
      tpu.vector_store %arg15[%c0_77, %c0_78], %148 {strides = array<i32>} : memref<4x512xf32, #tpu.memory_space<vmem>>, vector<4x512xf32>,
    } else {
    }
    %c0 = arith.constant 0 : index
    %c0_1 = arith.constant 0 : index
    %3 = vector.load %arg15[%c0, %c0_1] : memref<4x512xf32, #tpu.memory_space<vmem>>, vector<4x512xf32>
    %c0_2 = arith.constant 0 : index
    %c0_3 = arith.constant 0 : index
    %c0_4 = arith.constant 0 : index
    %4 = vector.load %arg5[%c0_2, %c0_3, %c0_4] : memref<1x8x4xf32, #tpu.memory_space<vmem>>, vector<1x8x4xf32>
    %5 = vector.shape_cast %4 : vector<1x8x4xf32> to vector<8x4xf32>
    %cst = arith.constant dense<0.000000e+00> : vector<8x512xf32>
    %6 = tpu.matmul %5, %3, %cst {dimension_numbers = #tpu.dot_dimension_numbers<[1], [0], [0], [1], [0, 0, 1, 1], [], []>} : vector<8x4xf32>, vector<4x512xf32>, vector<8x512xf32> -> vector<8x512xf32>
    %c0_5 = arith.constant 0 : index
    %c0_6 = arith.constant 0 : index
    %c0_7 = arith.constant 0 : index
    %7 = vector.load %arg6[%c0_5, %c0_6, %c0_7] : memref<1x8x1xf32, #tpu.memory_space<vmem>>, vector<1x8x1xf32>
    %8 = vector.shape_cast %7 : vector<1x8x1xf32> to vector<8x1xf32>
    %9 = vector.broadcast %8 : vector<8x1xf32> to vector<8x512xf32>
    %10 = arith.addf %6, %9 : vector<8x512xf32>
    %cst_8 = arith.constant 0.000000e+00 : f32
    %11 = vector.broadcast %cst_8 : f32 to vector<8x512xf32>
    %12 = arith.maximumf %10, %11 : vector<8x512xf32>
    %13 = vector.extract_strided_slice %12 {offsets = [0, 495], sizes = [8, 17], strides = [1, 1]} : vector<8x512xf32> to vector<8x17xf32>
    %14 = vector.extract_strided_slice %12 {offsets = [0, 0], sizes = [8, 495], strides = [1, 1]} : vector<8x512xf32> to vector<8x495xf32>
    %15 = tpu.concatenate %13, %14 in 1 : vector<8x17xf32>, vector<8x495xf32> -> vector<8x512xf32>
    %c0_9 = arith.constant 0 : index
    %c0_10 = arith.constant 0 : index
    %16 = vector.load %arg2[%c0_9, %c0_10] : memref<8x512xf32, #tpu.memory_space<vmem>>, vector<1x512xf32>
    %17 = vector.broadcast %16 : vector<1x512xf32> to vector<8x512xf32>
    %18 = arith.mulf %15, %17 : vector<8x512xf32>
    %c0_11 = arith.constant 0 : index
    %c0_12 = arith.constant 0 : index
    %19 = vector.load %arg16[%c0_11, %c0_12] : memref<72x512xf32, #tpu.memory_space<vmem>>, vector<8x512xf32>
    tpu.vector_store %arg16[%c0_11, %c0_12], %18 {strides = array<i32>} : memref<72x512xf32, #tpu.memory_space<vmem>>, vector<8x512xf32>,
    %20 = vector.extract_strided_slice %12 {offsets = [0, 496], sizes = [8, 16], strides = [1, 1]} : vector<8x512xf32> to vector<8x16xf32>
    %21 = vector.extract_strided_slice %12 {offsets = [0, 0], sizes = [8, 496], strides = [1, 1]} : vector<8x512xf32> to vector<8x496xf32>
    %22 = tpu.concatenate %20, %21 in 1 : vector<8x16xf32>, vector<8x496xf32> -> vector<8x512xf32>
    %c1 = arith.constant 1 : index
    %c0_13 = arith.constant 0 : index
    %23 = vector.load %arg2[%c1, %c0_13] : memref<8x512xf32, #tpu.memory_space<vmem>>, vector<1x512xf32>
    %24 = vector.broadcast %23 : vector<1x512xf32> to vector<8x512xf32>
    %25 = arith.mulf %22, %24 : vector<8x512xf32>
    %c8 = arith.constant 8 : index
    %c0_14 = arith.constant 0 : index
    %26 = vector.load %arg16[%c8, %c0_14] : memref<72x512xf32, #tpu.memory_space<vmem>>, vector<8x512xf32>
    tpu.vector_store %arg16[%c8, %c0_14], %25 {strides = array<i32>} : memref<72x512xf32, #tpu.memory_space<vmem>>, vector<8x512xf32>,
    %27 = vector.extract_strided_slice %12 {offsets = [0, 497], sizes = [8, 15], strides = [1, 1]} : vector<8x512xf32> to vector<8x15xf32>
    %28 = vector.extract_strided_slice %12 {offsets = [0, 0], sizes = [8, 497], strides = [1, 1]} : vector<8x512xf32> to vector<8x497xf32>
    %29 = tpu.concatenate %27, %28 in 1 : vector<8x15xf32>, vector<8x497xf32> -> vector<8x512xf32>
    %c2 = arith.constant 2 : index
    %c0_15 = arith.constant 0 : index
    %30 = vector.load %arg2[%c2, %c0_15] : memref<8x512xf32, #tpu.memory_space<vmem>>, vector<1x512xf32>
    %31 = vector.broadcast %30 : vector<1x512xf32> to vector<8x512xf32>
    %32 = arith.mulf %29, %31 : vector<8x512xf32>
    %c16 = arith.constant 16 : index
    %c0_16 = arith.constant 0 : index
    %33 = vector.load %arg16[%c16, %c0_16] : memref<72x512xf32, #tpu.memory_space<vmem>>, vector<8x512xf32>
    tpu.vector_store %arg16[%c16, %c0_16], %32 {strides = array<i32>} : memref<72x512xf32, #tpu.memory_space<vmem>>, vector<8x512xf32>,
    %34 = vector.extract_strided_slice %12 {offsets = [0, 511], sizes = [8, 1], strides = [1, 1]} : vector<8x512xf32> to vector<8x1xf32>
    %35 = vector.extract_strided_slice %12 {offsets = [0, 0], sizes = [8, 511], strides = [1, 1]} : vector<8x512xf32> to vector<8x511xf32>
    %36 = tpu.concatenate %34, %35 in 1 : vector<8x1xf32>, vector<8x511xf32> -> vector<8x512xf32>
    %c3 = arith.constant 3 : index
    %c0_17 = arith.constant 0 : index
    %37 = vector.load %arg2[%c3, %c0_17] : memref<8x512xf32, #tpu.memory_space<vmem>>, vector<1x512xf32>
    %38 = vector.broadcast %37 : vector<1x512xf32> to vector<8x512xf32>
    %39 = arith.mulf %36, %38 : vector<8x512xf32>
    %c24 = arith.constant 24 : index
    %c0_18 = arith.constant 0 : index
    %40 = vector.load %arg16[%c24, %c0_18] : memref<72x512xf32, #tpu.memory_space<vmem>>, vector<8x512xf32>
    tpu.vector_store %arg16[%c24, %c0_18], %39 {strides = array<i32>} : memref<72x512xf32, #tpu.memory_space<vmem>>, vector<8x512xf32>,
    %c32 = arith.constant 32 : index
    %c0_19 = arith.constant 0 : index
    %41 = vector.load %arg16[%c32, %c0_19] : memref<72x512xf32, #tpu.memory_space<vmem>>, vector<8x512xf32>
    tpu.vector_store %arg16[%c32, %c0_19], %12 {strides = array<i32>} : memref<72x512xf32, #tpu.memory_space<vmem>>, vector<8x512xf32>,
    %42 = vector.extract_strided_slice %12 {offsets = [0, 1], sizes = [8, 511], strides = [1, 1]} : vector<8x512xf32> to vector<8x511xf32>
    %43 = vector.extract_strided_slice %12 {offsets = [0, 0], sizes = [8, 1], strides = [1, 1]} : vector<8x512xf32> to vector<8x1xf32>
    %44 = tpu.concatenate %42, %43 in 1 : vector<8x511xf32>, vector<8x1xf32> -> vector<8x512xf32>
    %c4 = arith.constant 4 : index
    %c0_20 = arith.constant 0 : index
    %45 = vector.load %arg2[%c4, %c0_20] : memref<8x512xf32, #tpu.memory_space<vmem>>, vector<1x512xf32>
    %46 = vector.broadcast %45 : vector<1x512xf32> to vector<8x512xf32>
    %47 = arith.mulf %44, %46 : vector<8x512xf32>
    %c40 = arith.constant 40 : index
    %c0_21 = arith.constant 0 : index
    %48 = vector.load %arg16[%c40, %c0_21] : memref<72x512xf32, #tpu.memory_space<vmem>>, vector<8x512xf32>
    tpu.vector_store %arg16[%c40, %c0_21], %47 {strides = array<i32>} : memref<72x512xf32, #tpu.memory_space<vmem>>, vector<8x512xf32>,
    %49 = vector.extract_strided_slice %12 {offsets = [0, 15], sizes = [8, 497], strides = [1, 1]} : vector<8x512xf32> to vector<8x497xf32>
    %50 = vector.extract_strided_slice %12 {offsets = [0, 0], sizes = [8, 15], strides = [1, 1]} : vector<8x512xf32> to vector<8x15xf32>
    %51 = tpu.concatenate %49, %50 in 1 : vector<8x497xf32>, vector<8x15xf32> -> vector<8x512xf32>
    %c5 = arith.constant 5 : index
    %c0_22 = arith.constant 0 : index
    %52 = vector.load %arg2[%c5, %c0_22] : memref<8x512xf32, #tpu.memory_space<vmem>>, vector<1x512xf32>
    %53 = vector.broadcast %52 : vector<1x512xf32> to vector<8x512xf32>
    %54 = arith.mulf %51, %53 : vector<8x512xf32>
    %c48 = arith.constant 48 : index
    %c0_23 = arith.constant 0 : index
    %55 = vector.load %arg16[%c48, %c0_23] : memref<72x512xf32, #tpu.memory_space<vmem>>, vector<8x512xf32>
    tpu.vector_store %arg16[%c48, %c0_23], %54 {strides = array<i32>} : memref<72x512xf32, #tpu.memory_space<vmem>>, vector<8x512xf32>,
    %56 = vector.extract_strided_slice %12 {offsets = [0, 16], sizes = [8, 496], strides = [1, 1]} : vector<8x512xf32> to vector<8x496xf32>
    %57 = vector.extract_strided_slice %12 {offsets = [0, 0], sizes = [8, 16], strides = [1, 1]} : vector<8x512xf32> to vector<8x16xf32>
    %58 = tpu.concatenate %56, %57 in 1 : vector<8x496xf32>, vector<8x16xf32> -> vector<8x512xf32>
    %c6 = arith.constant 6 : index
    %c0_24 = arith.constant 0 : index
    %59 = vector.load %arg2[%c6, %c0_24] : memref<8x512xf32, #tpu.memory_space<vmem>>, vector<1x512xf32>
    %60 = vector.broadcast %59 : vector<1x512xf32> to vector<8x512xf32>
    %61 = arith.mulf %58, %60 : vector<8x512xf32>
    %c56 = arith.constant 56 : index
    %c0_25 = arith.constant 0 : index
    %62 = vector.load %arg16[%c56, %c0_25] : memref<72x512xf32, #tpu.memory_space<vmem>>, vector<8x512xf32>
    tpu.vector_store %arg16[%c56, %c0_25], %61 {strides = array<i32>} : memref<72x512xf32, #tpu.memory_space<vmem>>, vector<8x512xf32>,
    %63 = vector.extract_strided_slice %12 {offsets = [0, 17], sizes = [8, 495], strides = [1, 1]} : vector<8x512xf32> to vector<8x495xf32>
    %64 = vector.extract_strided_slice %12 {offsets = [0, 0], sizes = [8, 17], strides = [1, 1]} : vector<8x512xf32> to vector<8x17xf32>
    %65 = tpu.concatenate %63, %64 in 1 : vector<8x495xf32>, vector<8x17xf32> -> vector<8x512xf32>
    %c7 = arith.constant 7 : index
    %c0_26 = arith.constant 0 : index
    %66 = vector.load %arg2[%c7, %c0_26] : memref<8x512xf32, #tpu.memory_space<vmem>>, vector<1x512xf32>
    %67 = vector.broadcast %66 : vector<1x512xf32> to vector<8x512xf32>
    %68 = arith.mulf %65, %67 : vector<8x512xf32>
    %c64 = arith.constant 64 : index
    %c0_27 = arith.constant 0 : index
    %69 = vector.load %arg16[%c64, %c0_27] : memref<72x512xf32, #tpu.memory_space<vmem>>, vector<8x512xf32>
    tpu.vector_store %arg16[%c64, %c0_27], %68 {strides = array<i32>} : memref<72x512xf32, #tpu.memory_space<vmem>>, vector<8x512xf32>,
    %c0_28 = arith.constant 0 : index
    %c0_29 = arith.constant 0 : index
    %c0_30 = arith.constant 0 : index
    %70 = vector.load %arg7[%c0_28, %c0_29, %c0_30] : memref<1x8x72xf32, #tpu.memory_space<vmem>>, vector<1x8x72xf32>
    %71 = vector.shape_cast %70 : vector<1x8x72xf32> to vector<8x72xf32>
    %c0_31 = arith.constant 0 : index
    %c0_32 = arith.constant 0 : index
    %72 = vector.load %arg16[%c0_31, %c0_32] : memref<72x512xf32, #tpu.memory_space<vmem>>, vector<72x512xf32>
    %cst_33 = arith.constant dense<0.000000e+00> : vector<8x512xf32>
    %73 = tpu.matmul %71, %72, %cst_33 {dimension_numbers = #tpu.dot_dimension_numbers<[1], [0], [0], [1], [0, 0, 1, 1], [], []>} : vector<8x72xf32>, vector<72x512xf32>, vector<8x512xf32> -> vector<8x512xf32>
    %c0_34 = arith.constant 0 : index
    %c0_35 = arith.constant 0 : index
    %c0_36 = arith.constant 0 : index
    %74 = vector.load %arg8[%c0_34, %c0_35, %c0_36] : memref<1x8x1xf32, #tpu.memory_space<vmem>>, vector<1x8x1xf32>
    %75 = vector.shape_cast %74 : vector<1x8x1xf32> to vector<8x1xf32>
    %76 = vector.broadcast %75 : vector<8x1xf32> to vector<8x512xf32>
    %77 = arith.addf %73, %76 : vector<8x512xf32>
    %cst_37 = arith.constant 0.000000e+00 : f32
    %78 = vector.broadcast %cst_37 : f32 to vector<8x512xf32>
    %79 = arith.maximumf %77, %78 : vector<8x512xf32>
    %c0_38 = arith.constant 0 : index
    %c0_39 = arith.constant 0 : index
    %80 = vector.load %arg3[%c0_38, %c0_39] : memref<512x2xf32, #tpu.memory_space<vmem>>, vector<512x2xf32>
    %cst_40 = arith.constant dense<0.000000e+00> : vector<8x2xf32>
    %81 = tpu.matmul %79, %80, %cst_40 {dimension_numbers = #tpu.dot_dimension_numbers<[1], [0], [0], [1], [0, 0, 1, 1], [], []>} : vector<8x512xf32>, vector<512x2xf32>, vector<8x2xf32> -> vector<8x2xf32>
    %82 = vector.extract_strided_slice %79 {offsets = [0, 0], sizes = [8, 256], strides = [1, 1]} : vector<8x512xf32> to vector<8x256xf32>
    %cst_41 = arith.constant dense<0xFF800000> : vector<8xf32>
    %83 = vector.multi_reduction <maximumf>, %82, %cst_41 [1] : vector<8x256xf32> to vector<8xf32>
    %84 = vector.shape_cast %83 : vector<8xf32> to vector<8x1xf32>
    %85 = vector.extract_strided_slice %79 {offsets = [0, 256], sizes = [8, 256], strides = [1, 1]} : vector<8x512xf32> to vector<8x256xf32>
    %cst_42 = arith.constant dense<0xFF800000> : vector<8xf32>
    %86 = vector.multi_reduction <maximumf>, %85, %cst_42 [1] : vector<8x256xf32> to vector<8xf32>
    %87 = vector.shape_cast %86 : vector<8xf32> to vector<8x1xf32>
    %88 = tpu.concatenate %84, %87 in 1 : vector<8x1xf32>, vector<8x1xf32> -> vector<8x2xf32>
    %89 = tpu.concatenate %81, %88 in 0 : vector<8x2xf32>, vector<8x2xf32> -> vector<16x2xf32>
    %c0_43 = arith.constant 0 : index
    %c0_44 = arith.constant 0 : index
    %c0_45 = arith.constant 0 : index
    %90 = vector.load %arg9[%c0_43, %c0_44, %c0_45] : memref<1x2x16xf32, #tpu.memory_space<vmem>>, vector<1x2x16xf32>
    %91 = vector.shape_cast %90 : vector<1x2x16xf32> to vector<2x16xf32>
    %cst_46 = arith.constant dense<0.000000e+00> : vector<2x2xf32>
    %92 = tpu.matmul %91, %89, %cst_46 {dimension_numbers = #tpu.dot_dimension_numbers<[1], [0], [0], [1], [0, 0, 1, 1], [], []>} : vector<2x16xf32>, vector<16x2xf32>, vector<2x2xf32> -> vector<2x2xf32>
    %cst_47 = arith.constant 0.000000e+00 : f32
    %93 = vector.broadcast %cst_47 : f32 to vector<2x2xf32>
    %94 = arith.maximumf %92, %93 : vector<2x2xf32>
    %c0_48 = arith.constant 0 : index
    %c0_49 = arith.constant 0 : index
    %c0_50 = arith.constant 0 : index
    %95 = vector.load %arg10[%c0_48, %c0_49, %c0_50] : memref<1x8x2xf32, #tpu.memory_space<vmem>>, vector<1x8x2xf32>
    %96 = vector.shape_cast %95 : vector<1x8x2xf32> to vector<8x2xf32>
    %cst_51 = arith.constant dense<0.000000e+00> : vector<8x2xf32>
    %97 = tpu.matmul %96, %94, %cst_51 {dimension_numbers = #tpu.dot_dimension_numbers<[1], [0], [0], [1], [0, 0, 1, 1], [], []>} : vector<8x2xf32>, vector<2x2xf32>, vector<8x2xf32> -> vector<8x2xf32>
    %98 = arith.negf %97 : vector<8x2xf32>
    %99 = math.exp %98 : vector<8x2xf32>
    %cst_52 = arith.constant 1.000000e+00 : f32
    %100 = vector.broadcast %cst_52 : f32 to vector<8x2xf32>
    %101 = arith.addf %100, %99 : vector<8x2xf32>
    %102 = arith.divf %100, %101 : vector<8x2xf32>
    %c0_53 = arith.constant 0 : index
    %c0_54 = arith.constant 0 : index
    %103 = vector.load %arg4[%c0_53, %c0_54] : memref<2x512xf32, #tpu.memory_space<vmem>>, vector<2x512xf32>
    %cst_55 = arith.constant dense<0.000000e+00> : vector<8x512xf32>
    %104 = tpu.matmul %102, %103, %cst_55 {dimension_numbers = #tpu.dot_dimension_numbers<[1], [0], [0], [1], [0, 0, 1, 1], [], []>} : vector<8x2xf32>, vector<2x512xf32>, vector<8x512xf32> -> vector<8x512xf32>
    %105 = arith.mulf %79, %104 : vector<8x512xf32>
    %cst_56 = arith.constant dense<0.000000e+00> : vector<512xf32>
    %106 = vector.multi_reduction <add>, %105, %cst_56 [0] : vector<8x512xf32> to vector<512xf32>
    %107 = vector.shape_cast %106 : vector<512xf32> to vector<1x512xf32>
    %cst_57 = arith.constant 8.000000e+00 : f32
    %108 = vector.broadcast %cst_57 : f32 to vector<1x512xf32>
    %109 = arith.divf %107, %108 : vector<1x512xf32>
    %cst_58 = arith.constant dense<0xFF800000> : vector<512xf32>
    %110 = vector.multi_reduction <maximumf>, %105, %cst_58 [0] : vector<8x512xf32> to vector<512xf32>
    %111 = vector.shape_cast %110 : vector<512xf32> to vector<1x512xf32>
    %112 = vector.extract_strided_slice %109 {offsets = [0, 0], sizes = [1, 256], strides = [1, 1]} : vector<1x512xf32> to vector<1x256xf32>
    %113 = vector.extract_strided_slice %111 {offsets = [0, 0], sizes = [1, 256], strides = [1, 1]} : vector<1x512xf32> to vector<1x256xf32>
    %114 = tpu.concatenate %112, %113 in 1 : vector<1x256xf32>, vector<1x256xf32> -> vector<1x512xf32>
    %115 = vector.extract_strided_slice %109 {offsets = [0, 256], sizes = [1, 256], strides = [1, 1]} : vector<1x512xf32> to vector<1x256xf32>
    %116 = vector.extract_strided_slice %111 {offsets = [0, 256], sizes = [1, 256], strides = [1, 1]} : vector<1x512xf32> to vector<1x256xf32>
    %117 = tpu.concatenate %115, %116 in 1 : vector<1x256xf32>, vector<1x256xf32> -> vector<1x512xf32>
    %118 = tpu.concatenate %114, %117 in 0 : vector<1x512xf32>, vector<1x512xf32> -> vector<2x512xf32>
    %119 = arith.truncf %118 : vector<2x512xf32> to vector<2x512xbf16>
    %c0_59 = arith.constant 0 : index
    %c0_60 = arith.constant 0 : index
    %c0_61 = arith.constant 0 : index
    %120 = vector.load %arg11[%c0_59, %c0_60, %c0_61] : memref<1x512x256xbf16, #tpu.memory_space<vmem>>, vector<1x512x256xbf16>
    %121 = vector.shape_cast %120 : vector<1x512x256xbf16> to vector<512x256xbf16>
    %cst_62 = arith.constant dense<0.000000e+00> : vector<2x256xf32>
    %122 = tpu.matmul %119, %121, %cst_62 {dimension_numbers = #tpu.dot_dimension_numbers<[1], [0], [0], [1], [0, 0, 1, 1], [], []>} : vector<2x512xbf16>, vector<512x256xbf16>, vector<2x256xf32> -> vector<2x256xf32>
    %123 = vector.extract_strided_slice %122 {offsets = [0, 0], sizes = [1, 256], strides = [1, 1]} : vector<2x256xf32> to vector<1x256xf32>
    %124 = vector.extract_strided_slice %122 {offsets = [1, 0], sizes = [1, 256], strides = [1, 1]} : vector<2x256xf32> to vector<1x256xf32>
    %125 = tpu.concatenate %123, %124 in 1 : vector<1x256xf32>, vector<1x256xf32> -> vector<1x512xf32>
    %126 = arith.index_cast %arg0 : i32 to index
    %c0_63 = arith.constant 0 : index
    %127 = memref.load %arg12[%126, %c0_63] : memref<2x1xf32, #tpu.memory_space<smem>>
    %128 = vector.broadcast %127 : f32 to vector<1x512xf32>
    %129 = arith.addf %125, %128 : vector<1x512xf32>
    %130 = arith.negf %129 : vector<1x512xf32>
    %131 = math.exp %130 : vector<1x512xf32>
    %cst_64 = arith.constant 1.000000e+00 : f32
    %132 = vector.broadcast %cst_64 : f32 to vector<1x512xf32>
    %133 = arith.addf %132, %131 : vector<1x512xf32>
    %134 = arith.divf %132, %133 : vector<1x512xf32>
    %135 = vector.broadcast %134 : vector<1x512xf32> to vector<8x512xf32>
    %136 = arith.mulf %105, %135 : vector<8x512xf32>
    %c0_65 = arith.constant 0 : index
    %c0_66 = arith.constant 0 : index
    %c0_67 = arith.constant 0 : index
    %137 = vector.load %arg13[%c0_65, %c0_66, %c0_67] : memref<1x4x8xf32, #tpu.memory_space<vmem>>, vector<1x4x8xf32>
    %138 = vector.shape_cast %137 : vector<1x4x8xf32> to vector<4x8xf32>
    %cst_68 = arith.constant dense<0.000000e+00> : vector<4x512xf32>
    %139 = tpu.matmul %138, %136, %cst_68 {dimension_numbers = #tpu.dot_dimension_numbers<[1], [0], [0], [1], [0, 0, 1, 1], [], []>} : vector<4x8xf32>, vector<8x512xf32>, vector<4x512xf32> -> vector<4x512xf32>
    %c0_69 = arith.constant 0 : index
    %c0_70 = arith.constant 0 : index
    %c0_71 = arith.constant 0 : index
    %140 = vector.load %arg14[%c0_69, %c0_70, %c0_71] : memref<1x4x1xf32, #tpu.memory_space<vmem>>, vector<1x4x1xf32>
    %141 = vector.shape_cast %140 : vector<1x4x1xf32> to vector<4x1xf32>
    %142 = vector.broadcast %141 : vector<4x1xf32> to vector<4x512xf32>
    %143 = arith.addf %139, %142 : vector<4x512xf32>
    %144 = arith.addf %143, %3 : vector<4x512xf32>
    %cst_72 = arith.constant 0.000000e+00 : f32
    %145 = vector.broadcast %cst_72 : f32 to vector<4x512xf32>
    %146 = arith.maximumf %144, %145 : vector<4x512xf32>
    %c0_73 = arith.constant 0 : index
    %c0_74 = arith.constant 0 : index
    %147 = vector.load %arg15[%c0_73, %c0_74] : memref<4x512xf32, #tpu.memory_space<vmem>>, vector<4x512xf32>
    tpu.vector_store %arg15[%c0_73, %c0_74], %146 {strides = array<i32>} : memref<4x512xf32, #tpu.memory_space<vmem>>, vector<4x512xf32>,
    return
  }
  func.func @transform_0(%arg0: i32) -> (i32, i32) {
    %c0_i32 = arith.constant 0 : i32
    %c0_i32_0 = arith.constant 0 : i32
    %c0_i32_1 = arith.constant 0 : i32
    return %c0_i32, %c0_i32_0 : i32, i32
  }
  func.func @transform_1(%arg0: i32) -> (i32, i32) {
    %c0_i32 = arith.constant 0 : i32
    %c0_i32_0 = arith.constant 0 : i32
    %c0_i32_1 = arith.constant 0 : i32
    return %c0_i32, %c0_i32_0 : i32, i32
  }
  func.func @transform_2(%arg0: i32) -> (i32, i32) {
    %c0_i32 = arith.constant 0 : i32
    %c0_i32_0 = arith.constant 0 : i32
    %c0_i32_1 = arith.constant 0 : i32
    return %c0_i32, %c0_i32_0 : i32, i32
  }
  func.func @transform_3(%arg0: i32) -> (i32, i32) {
    %c0_i32 = arith.constant 0 : i32
    %c0_i32_0 = arith.constant 0 : i32
    %c0_i32_1 = arith.constant 0 : i32
    return %c0_i32, %c0_i32_0 : i32, i32
  }
  func.func @transform_4(%arg0: i32) -> (i32, i32, i32) {
    %c0_i32 = arith.constant 0 : i32
    %c0_i32_0 = arith.constant 0 : i32
    %c0_i32_1 = arith.constant 0 : i32
    return %arg0, %c0_i32, %c0_i32_0 : i32, i32, i32
  }
  func.func @transform_5(%arg0: i32) -> (i32, i32, i32) {
    %c0_i32 = arith.constant 0 : i32
    %c0_i32_0 = arith.constant 0 : i32
    %c0_i32_1 = arith.constant 0 : i32
    return %arg0, %c0_i32, %c0_i32_0 : i32, i32, i32
  }
  func.func @transform_6(%arg0: i32) -> (i32, i32, i32) {
    %c0_i32 = arith.constant 0 : i32
    %c0_i32_0 = arith.constant 0 : i32
    %c0_i32_1 = arith.constant 0 : i32
    return %arg0, %c0_i32, %c0_i32_0 : i32, i32, i32
  }
  func.func @transform_7(%arg0: i32) -> (i32, i32, i32) {
    %c0_i32 = arith.constant 0 : i32
    %c0_i32_0 = arith.constant 0 : i32
    %c0_i32_1 = arith.constant 0 : i32
    return %arg0, %c0_i32, %c0_i32_0 : i32, i32, i32
  }
  func.func @transform_8(%arg0: i32) -> (i32, i32, i32) {
    %c0_i32 = arith.constant 0 : i32
    %c0_i32_0 = arith.constant 0 : i32
    %c0_i32_1 = arith.constant 0 : i32
    return %arg0, %c0_i32, %c0_i32_0 : i32, i32, i32
  }
  func.func @transform_9(%arg0: i32) -> (i32, i32, i32) {
    %c0_i32 = arith.constant 0 : i32
    %c0_i32_0 = arith.constant 0 : i32
    %c0_i32_1 = arith.constant 0 : i32
    return %arg0, %c0_i32, %c0_i32_0 : i32, i32, i32
  }
  func.func @transform_10(%arg0: i32) -> (i32, i32, i32) {
    %c0_i32 = arith.constant 0 : i32
    %c0_i32_0 = arith.constant 0 : i32
    %c0_i32_1 = arith.constant 0 : i32
    return %arg0, %c0_i32, %c0_i32_0 : i32, i32, i32
  }
  func.func @transform_11(%arg0: i32) -> (i32, i32) {
    %c0_i32 = arith.constant 0 : i32
    %c0_i32_0 = arith.constant 0 : i32
    %c0_i32_1 = arith.constant 0 : i32
    return %c0_i32, %c0_i32_0 : i32, i32
  }
  func.func @transform_12(%arg0: i32) -> (i32, i32, i32) {
    %c0_i32 = arith.constant 0 : i32
    %c0_i32_0 = arith.constant 0 : i32
    %c0_i32_1 = arith.constant 0 : i32
    return %arg0, %c0_i32, %c0_i32_0 : i32, i32, i32
  }
  func.func @transform_13(%arg0: i32) -> (i32, i32, i32) {
    %c0_i32 = arith.constant 0 : i32
    %c0_i32_0 = arith.constant 0 : i32
    %c0_i32_1 = arith.constant 0 : i32
    return %arg0, %c0_i32, %c0_i32_0 : i32, i32, i32
  }
  func.func @transform_14(%arg0: i32) -> (i32, i32) {
    %c0_i32 = arith.constant 0 : i32
    %c0_i32_0 = arith.constant 0 : i32
    %c0_i32_1 = arith.constant 0 : i32
    return %c0_i32, %c0_i32_0 : i32, i32
  }
}

</mosaic_0001>

<bundles_post_ra>
// kernel: tpu_custom_call.1
= control target key start
LH: loop header
LB: loop body
LE: loop exit
PB: predicated region body
PF: predicated region fallthrough
CT: control target
= control target key end

     0   :  { %s4357_s0 = inlined_call_operand.vmem [shape: f32[4,512], index: 0, kind: input, shape index: {}]   ;;  %s4358_s1 = inlined_call_operand.vmem [shape: f32[8,512], index: 1, kind: input, shape index: {}]   ;;  %s4359_s2 = inlined_call_operand.vmem [shape: f32[512,2], index: 2, kind: input, shape index: {}]   ;;  %s4360_s3 = inlined_call_operand.vmem [shape: f32[2,512], index: 3, kind: input, shape index: {}]   ;;  %s4361_s4 = inlined_call_operand.vmem [shape: f32[2,8,4], index: 4, kind: input, shape index: {}]   ;;  %s4362_s5 = inlined_call_operand.vmem [shape: f32[2,8,1], index: 5, kind: input, shape index: {}]   ;;  %s4363_s6 = inlined_call_operand.vmem [shape: f32[2,8,72], index: 6, kind: input, shape index: {}]   ;;  %s4364_s7 = inlined_call_operand.vmem [shape: f32[2,8,1], index: 7, kind: input, shape index: {}]   ;;  %s4365_s8 = inlined_call_operand.vmem [shape: f32[2,2,16], index: 8, kind: input, shape index: {}]   ;;  %s4366_s9 = inlined_call_operand.vmem [shape: f32[2,8,2], index: 9, kind: input, shape index: {}]   ;;  %s4367_s10 = inlined_call_operand.hbm [shape: bf16[2,512,256], index: 10, kind: input, shape index: {}]   ;;  %s4368_s11 = inlined_call_operand.vmem [shape: f32[2,1], index: 11, kind: input, shape index: {}]   ;;  %s4369_s12 = inlined_call_operand.vmem [shape: f32[2,4,8], index: 12, kind: input, shape index: {}]   ;;  %s4370_s13 = inlined_call_operand.vmem [shape: f32[2,4,1], index: 13, kind: input, shape index: {}]   ;;  %s4371_s14 = inlined_call_operand.hbm [shape: f32[4,512], index: 14, kind: output, shape index: {}]  }
   0x1   :  { %4380 = sst [smem:[#allocation17_spill]] %s4360_s3 }
   0x2   :  { %4381 = sst [smem:[#allocation18_spill]] %s4361_s4 }
   0x3   :  { %4382 = sst [smem:[#allocation19_spill]] %s4362_s5 }
   0x4   :  { %4383 = sst [smem:[#allocation20_spill]] %s4367_s10 }
   0x5   :  { %4384 = sst [smem:[#allocation21_spill]] %s4368_s11 }
   0x6   :  { %4385 = sst [smem:[#allocation22_spill]] %s4371_s14 }
   0x7   :  { %19 = vsyncpa [#allocation4], 0 }
   0x8   :  { %21 = vsyncpa [#allocation4 + $0x1], 0 }
   0x9   :  { %22 = vsyncpa [#allocation6], 0 }
   0xa   :  { %23 = vsyncpa [#allocation5], 0  ;;  %s3589_s29 = smov 0   ;;  %s3591_s30 = smov 0  }
   0xb   :  { %s3593_s15 = smov 0   ;;  %s3595_s16 = smov 0  }
   0xc LB: > { %4386 = sst [smem:[#allocation12_spill]] %s3486_s30  ;;  %s3608_s17 = sadd.s32 4294967295, %s3494_s16   ;;  %s3494_s16 = sphi %s3595_s16, %s4407_s16   ;;  %s3490_s15 = sphi %s3593_s15, %s4410_s15   ;;  %s3486_s30 = sphi %s3591_s30, %s4409_s30   ;;  %s3482_s29 = sphi %s3589_s29, %s4408_s29  }
   0xd   : > { %4387 = sst [smem:[#allocation13_spill]] %s3490_s15  ;;  %s3611_s18 = sadd.s32 1, %s3494_s16  }
   0xe   : > { %4388 = sst [smem:[#allocation14_spill]] %s3611_s18  ;;  %s273_s19 = ssub.s32 %s3494_s16, %s3611_s18 }
   0xf   : > { %s276_s20 = sadd.s32 1, %s3490_s15  ;;  %p274_p0 = scmp.eq.s32.totalorder %s273_s19, 0 }
  0x10   : > { %p283_p1 = scmp.ne.s32.totalorder %s3490_s15, %s3486_s30  ;;  %p284_p2 = scmp.eq.s32.totalorder %s3494_s16, 0 }
  0x11   : > { %p289_p3 = scmp.ne.s32.totalorder %s3486_s30, %s3482_s29  ;;  %p4377_p5 = scmp.eq.s32.totalorder %s3608_s17, 0 }
  0x12   : > { %s3621_s21 = scalar_select %p274_p0, %s3490_s15, %s276_s20  }
  0x13   : > { %p3623_p4 = por %p284_p2, %p283_p1  ;;  %p2879_p6 = scmp.ge.s32.totalorder %s3494_s16, 1 }
  0x14   : > { %4389 = sst [smem:[#allocation15_spill]] %s3621_s21  ;;  %p394_p7 = scmp.lt.s32.totalorder %s3494_s16, 3 }
  0x15   : > { %p3632_p8 = por %p4377_p5, %p289_p3  ;;  %s4393_s11 = sld [smem:[#allocation21_spill]] }
  0x16   : > { %p3637_p10 = pnand %p2879_p6, %p394_p7  ;;  %p3205_p12 = scmp.lt.s32.totalorder %s3494_s16, 2 }
  0x17   : > { %s4391_s23 = scalar_select %p3632_p8, 1, 0 }
  0x18   : > { %p3196_p11 = pneg %p3637_p10  ;;  %s472_s28 = sand.u32 1, %s3490_s15  }
  0x19   : > { %p3656_p0 = pnand %p3205_p12, %p3623_p4  ;;  %s2882_s20 = sshll.u32 %s472_s28, 9 }
  0x1a   : > { %p3650_p13 = pnand %p3196_p11, %p4377_p5 }
  0x1b   : > { %s419_s27 = sshll.u32 %s4393_s11, 4  ;;  %s420_s27 = int_to_ptr.vmem [resolvable:$true] %s419_s27 }
  0x1c   : > { %s3381_s25 = scalar_lea.vmem %s420_s27, 32  ;;  %p3383_p2 = pneg %p3650_p13 }
  0x1d   : > { %p3382_p1 = scmp.ne.s32.totalorder %s420_s27, %s3381_s25  ;;  %p3389_p7 = scmp.lt.s32.totalorder %s420_s27, %s420_s27 }
  0x1e   : > { %p3390_p9 = scmp.lt.s32.totalorder %s3381_s25, %s3381_s25 }
  0x1f   : > { %p3384_p3 = pnand %p3383_p2, %p3382_p1 }
  0x20   : > { %p3391_p8 = por %p3390_p9, %p3389_p7 }
  0x21   : > { %p3385_p6 = pneg %p3384_p3 }
  0x23   : > { %p3392_p11 = pnand %p3391_p8, %p3385_p6 }
  0x25   : > { %3395 = shalt.err (!%p3392_p11)
}
  0x26   : > { %s3496_s26 = smov [#allocation7]   ;;  %s2997_s22 = sshll.u32 %s3494_s16, 13 }
  0x27   : > { %3199 = dma.vmem_to_smem (!%p3650_p13), %s420_s27, 32, %s3496_s26, [#allocation6]  }
  0x28   : > { %s4396_s10 = sld [smem:[#allocation20_spill]]  ;;  %s476_s25 = scalar_lea.vmem [#allocation3], %s2882_s20 }
  0x29   : > { %s483_s18 = sshll.u32 %s476_s25, 4  ;;  %s3672_s14 = scalar_lea.sflag [#allocation4], %s472_s28  ;;  %s3670_s18 = int_to_ptr.vmem [resolvable:$true] %s483_s18 }
  0x2a   : > { %p3398_p8 = pneg %p3656_p0 }
  0x2e   : > { %s3668_s15 = scalar_lea.hbm %s4396_s10, %s2997_s22  ;;  %s3401_s21 = scalar_lea.hbm %s4396_s10, 16384 }
  0x2f   : > { %s3396_s29 = scalar_lea.hbm %s3668_s15, 8192  ;;  %p3402_p13 = scmp.lt.u32.totalorder %s3668_s15, %s4396_s10 }
  0x30   : > { %p3397_p4 = scmp.ne.s32.totalorder %s3668_s15, %s3396_s29  ;;  %p3403_p1 = scmp.lt.u32.totalorder %s3401_s21, %s3396_s29 }
  0x31   : > { %p3405_p3 = scmp.lt.u32.totalorder %s3396_s29, %s3668_s15 }
  0x32   : > { %p3399_p9 = pnand %p3398_p8, %p3397_p4  ;;  %p3404_p2 = por %p3403_p1, %p3402_p13 }
  0x34   : > { %p3400_p12 = pneg %p3399_p9  ;;  %p3406_p6 = por %p3405_p3, %p3404_p2 }
  0x36   : > { %p3407_p7 = pnand %p3406_p6, %p3400_p12 }
  0x38   : > { %3410 = shalt.err (!%p3407_p7)
}
  0x39   : > { %s3411_s28 = scalar_lea.vmem %s3670_s18, 8192  ;;  %s3497_s20 = smov [#allocation3]  }
  0x3a   : > { %p3412_p11 = scmp.ne.s32.totalorder %s3670_s18, %s3411_s28  ;;  %s3416_s22 = sshll.u32 %s3497_s20, 4  ;;  %s3417_s22 = int_to_ptr.vmem [resolvable:$false] %s3416_s22 }
  0x3b   : > { %s3418_s25 = scalar_lea.vmem %s3417_s22, 16384  ;;  %p3419_p5 = scmp.lt.s32.totalorder %s3670_s18, %s3417_s22 }
  0x3c   : > { %p3414_p4 = pnand %p3412_p11, %p3398_p8  ;;  %p3420_p13 = scmp.lt.s32.totalorder %s3418_s25, %s3411_s28 }
  0x3e   : > { %p3415_p9 = pneg %p3414_p4  ;;  %p3421_p1 = por %p3420_p13, %p3419_p5 }
  0x40   : > { %p3422_p2 = pnand %p3421_p1, %p3415_p9 }
  0x42   : > { %3425 = shalt.err (!%p3422_p2)
}
  0x43   : > { %s3498_s29 = smov 128   ;;  %s3499_s11 = smov 8  }
  0x44   : > { %3203 = dma.hbm_to_vmem [thread:$0]  (!%p3656_p0), %s3668_s15, 8192, %s3670_s18, %s3672_s14, %s3498_s29, %s3498_s29, %s3499_s11  }
  0x45   : > { %509 = sbr.rel (%p3637_p10) target bundleno = 2122 (0x84a), region = 76 }
  0x4c   : > { %s511_s16 = sand.u32 1, %s3486_s30   ;;  %p4398_p5 = scmp.ne.s32.totalorder %s4391_s23, 0 }
  0x4d   : > { %s2886_s21 = sshll.u32 %s511_s16, 9  ;;  %s512_s27 = scalar_lea.sflag [#allocation4], %s511_s16 }
  0x4e   : > { %s3703_s26 = scalar_lea.vmem [#allocation3], %s2886_s21 }
  0x4f   : > { %4397 = sst [smem:[#allocation16_spill]] %s3703_s26 }
  0x50   : > { %3469 = dma.done.wait (%p4398_p5), %s512_s27, 8192  }
  0x51   : > { %3471 = vsyncadd (%p4398_p5), %s512_s27, 4294959104  ;;  %p4399_p8 = scmp.eq.s32.totalorder %s3608_s17, 0 }
  0x53   : > { %3473 = dma.done.wait (%p4399_p8), [#allocation6], 32   ;;  %p4400_p0 = pmov %p4399_p8 }
  0x55   : > { %3475 = vsyncadd (%p4400_p0), [#allocation6], 4294967264 }
  0x56   : > { %524 = sfence }
  0x57   : > { %p592_p10 = scmp.lt.s32.totalorder %s3608_s17, 1  ;;  %s4401_s4 = sld [smem:[#allocation18_spill]] }
  0x58   : > { %s4402_s5 = sld [smem:[#allocation19_spill]]  ;;  %p4403_p12 = scmp.ne.s32.totalorder %s3608_s17, 0 }
  0x59   : > { %s593_s14 = scalar_select %p592_p10, %s3608_s17, 1 }
  0x5a   : > { %627 = sbr.rel (%p4403_p12) target bundleno = 97 (0x61), region = 88  ;;  %v628_v0 = vld [vmem:[%s4357_s0] sm:$0xff] (!%p4403_p12)  ;;  %v629_v1 = vld [vmem:[%s4357_s0 + $0x8] sm:$0xff] (!%p4403_p12) }
  0x5b   : > { %s3715_s15 = sshll.u32 %s593_s14, 3  ;;  %s2892_s18 = sshll.u32 %s593_s14, 1  ;;  %630 = vst [vmem:[#allocation8] sm:$0xff] (!%p4403_p12), %v628_v0  ;;  %631 = vst [vmem:[#allocation8 + $0x8] sm:$0xff] (!%p4403_p12), %v629_v1 }
  0x5c   : > { %s603_s11 = scalar_lea.vmem %s4363_s6, %s3715_s15  ;;  %s607_s27 = scalar_lea.vmem %s4364_s7, %s3715_s15 }
  0x5d   : > { %s595_s19 = scalar_lea.vmem %s4401_s4, %s3715_s15  ;;  %s3736_s3 = scalar_lea.vmem %s4365_s8, %s2892_s18 }
  0x5e   : > { %s599_s22 = scalar_lea.vmem %s4402_s5, %s3715_s15  ;;  %s615_s24 = scalar_lea.vmem %s4366_s9, %s3715_s15 }
  0x5f   : > { %s2894_s4 = sshll.u32 %s593_s14, 2 }
  0x60   : > { %s3745_s5 = scalar_lea.vmem %s4369_s12, %s2894_s4  ;;  %s3750_s16 = scalar_lea.vmem %s4370_s13, %s2894_s4 }
  0x61 PF: > { %vm649_vm0 = vcmask 1043456   ;;  %v634_v4 = vld [vmem:[%s595_s19] sm:$0xff]  ;;  %v3500_v7 = vmov 0.0   ;;  %vm645_vm1 = vcmask 31744   ;;  %v3501_v9 = vmov 0   ;;  %s3502_s4 = smov 17  }
  0x62   : > { %v632_v2 = vld [vmem:[#allocation8] sm:$0xff]  ;;  %v633_v3 = vld [vmem:[#allocation8 + $0x8] sm:$0xff]  ;;  %722 = vmatprep.mubr.f32.mxu0 %v3500_v7  ;;  %793 = vmatprep.mubr.f32.mxu1 %v3500_v7  ;;  %s3503_s14 = smov 16   ;;  %s3504_s19 = smov 127   ;;  %v828_v32 = vlaneseq  ;;  %vm817_vm2 = vcmask 138240   ;;  %vm865_vm3 = vcmask 130048  }
  0x63   : > { %v3760_v5 = vcombine.high %v632_v2, %v632_v2  ;;  %v3762_v6 = vcombine.high %v633_v3, %v633_v3  ;;  %v635_v8 = vld [vmem:[%s599_s22] sm:$0xff]  ;;  %3258 = vset.pattern.permute.xlu0 %v3501_v9  ;;  %3259 = vset.pattern.permute.xlu1 %v3501_v9  ;;  %s3505_s22 = smov 15   ;;  %s3506_s21 = smov 113   ;;  %vm1015_vm4 = vcmask 1039360   ;;  %vm914_vm5 = vcmask 121856  }
  0x64   : > { %638 = vperm.xlu0 %3258, %v635_v8   ;;  %s3507_s23 = smov 1   ;;  %s3508_s28 = smov 112   ;;  %v1240_v23 = vld [vmem:[%s607_s27] sm:$0xff]  ;;  %v3831_v35 = vshrl.u32 %v828_v32, 7  ;;  %vm963_vm6 = vcmask 7168   ;;  %vm1064_vm7 = vcmask 924672  }
  0x65   : > { %2897 = vmatprep.subr.msk.mxu0 %vm649_vm0, %v3760_v5  ;;  %2900 = vmatprep.subr.msk.mxu1 %vm649_vm0, %v3762_v6  ;;  %s3509_s20 = smov 111   ;;  %v826_v42 = vld [vmem:[%s4358_s1] ss:$8 sm:$0xf]  ;;  %vm1113_vm8 = vcmask 916480   ;;  %vm1162_vm9 = vcmask 908288  }
  0x66   : > { %2898 = vmatpush1.msk.msra.mxu0 %vm649_vm0, %v632_v2  ;;  %2901 = vmatpush1.msk.msra.mxu1 %vm649_vm0, %v633_v3  ;;  %v3836_v37 = vsub.s32 0, %v3831_v35  ;;  %v3839_v38 = vsub.s32 1, %v3831_v35  ;;  %v3842_v39 = vsub.s32 2, %v3831_v35  ;;  %v3845_v41 = vsub.s32 3, %v3831_v35  ;;  %s2986_s15 = sshll.u32 %s3608_s17, 7  ;;  %p3207_p3 = scmp.eq.s32.totalorder %s3608_s17, 1 }
  0x67   : > { %2899 = vmatmul.mubr.msk.f32.vlgmr.msra.gmra.mrb[0].mxu0 %vm645_vm1, %v634_v4  ;;  %2902 = vmatmul.mubr.msk.f32.vlgmr.msra.gmra.mrb[0].mxu1 %vm645_vm1, %v634_v4  ;;  %v2903_v43 = vld [vmem:[%s4358_s1 + $0x1] ss:$8 sm:$0xf]  ;;  %vm1246_vm10 = vcmask 588800   ;;  %vm3511_vm11 = vmmov 0   ;;  %vm1687_vm12 = vcmask 1041408  }
  0x68   : > { %1314 = vmatprep.mubr.f32.mxu0 %v3500_v7  ;;  %1385 = vmatprep.mubr.f32.mxu1 %v3500_v7  ;;  %v835_v44 = vrot.slane %v826_v42, %v3839_v38  ;;  %v839_v45 = vrot.slane %v826_v42, %v3842_v39  ;;  %v880_v47 = vrot.slane %v2903_v43, %v3836_v37  ;;  %vm1683_vm13 = vcmask 15360  }
  0x69   : > { %v892_v48 = vrot.slane %v2903_v43, %v3845_v41  ;;  %v831_v54 = vrot.slane %v826_v42, %v3836_v37  ;;  %v843_v55 = vrot.slane %v826_v42, %v3845_v41  ;;  %v884_v56 = vrot.slane %v2903_v43, %v3839_v38  ;;  %v3891_v42 = vld [vmem:[%s4358_s1 + $0x5] ss:$8 sm:$0xf] }
  0x6a   : > { %v888_v57 = vrot.slane %v2903_v43, %v3842_v39  ;;  %vm2008_vm14 = vcmask 1040384   ;;  %vm2547_vm15 = vcmask 64512  }
  0xe3   : > { %v639_v10 = vpop.permute.xlu0 %638 }
 0x13a   : > { %v724_v11 = vpop.f32.mrb[0].mxu0  ;;  %v795_v12 = vpop.f32.mrb[0].mxu1 }
 0x13b   : > { %v725_v13 = vadd.f32 %v724_v11, %v639_v10  ;;  %v796_v14 = vadd.f32 %v795_v12, %v639_v10  ;;  %v726_v15 = vpop.f32.mrb[1].mxu0  ;;  %v797_v16 = vpop.f32.mrb[1].mxu1 }
 0x13c   : > { %v727_v19 = vadd.f32 %v726_v15, %v639_v10  ;;  %v798_v21 = vadd.f32 %v797_v16, %v639_v10 }
 0x13d   : > { %v3774_v17 = vmax.f32 %v725_v13, 0.0  ;;  %v3776_v18 = vmax.f32 %v796_v14, 0.0 }
 0x13e   : > { %v3788_v20 = vmax.f32 %v727_v19, 0.0  ;;  %v3792_v22 = vmax.f32 %v798_v21, 0.0  ;;  %v3874_v19 = vld [vmem:[%s4358_s1 + $0x4] ss:$8 sm:$0xf] }
 0x13f   : > { %815 = vrot.lane.b32.xlu0 %v3776_v18, %s3502_s4  ;;  %811 = vrot.lane.b32.xlu1 %v3774_v17, %s3502_s4  ;;  %v2904_v21 = vld [vmem:[%s4358_s1 + $0x2] ss:$8 sm:$0xf]  ;;  %v1039_v43 = vrot.slane %v3874_v19, %v3842_v39 }
 0x140   : > { %v929_v32 = vrot.slane %v2904_v21, %v3836_v37 }
 0x143   : > { %859 = vrot.lane.b32.xlu0 %v3774_v17, %s3503_s14  ;;  %1007 = vrot.lane.b32.xlu1 %v3774_v17, %s3504_s19 }
 0x147   : > { %863 = vrot.lane.b32.xlu0 %v3776_v18, %s3503_s14  ;;  %1011 = vrot.lane.b32.xlu1 %v3776_v18, %s3504_s19 }
 0x14b   : > { %908 = vrot.lane.b32.xlu0 %v3774_v17, %s3505_s22  ;;  %1056 = vrot.lane.b32.xlu1 %v3774_v17, %s3506_s21 }
 0x14f   : > { %912 = vrot.lane.b32.xlu0 %v3776_v18, %s3505_s22  ;;  %1060 = vrot.lane.b32.xlu1 %v3776_v18, %s3506_s21 }
 0x153   : > { %957 = vrot.lane.b32.xlu0 %v3774_v17, %s3507_s23  ;;  %813 = vrot.lane.b32.xlu1 %v3788_v20, %s3502_s4 }
 0x157   : > { %961 = vrot.lane.b32.xlu0 %v3776_v18, %s3507_s23  ;;  %856 = vrot.lane.b32.xlu1 %v3792_v22, %s3503_s14 }
 0x15b   : > { %805 = vrot.lane.b32.xlu0 %v3792_v22, %s3502_s4  ;;  %861 = vrot.lane.b32.xlu1 %v3788_v20, %s3503_s14 }
 0x15f   : > { %1009 = vrot.lane.b32.xlu0 %v3788_v20, %s3504_s19  ;;  %905 = vrot.lane.b32.xlu1 %v3792_v22, %s3505_s22 }
 0x163   : > { %1013 = vrot.lane.b32.xlu0 %v3792_v22, %s3504_s19  ;;  %910 = vrot.lane.b32.xlu1 %v3788_v20, %s3505_s22  ;;  %s4405_s19 = sld [smem:[#allocation17_spill]] }
 0x167   : > { %1058 = vrot.lane.b32.xlu0 %v3788_v20, %s3506_s21  ;;  %954 = vrot.lane.b32.xlu1 %v3792_v22, %s3507_s23 }
 0x16b   : > { %1062 = vrot.lane.b32.xlu0 %v3792_v22, %s3506_s21  ;;  %959 = vrot.lane.b32.xlu1 %v3788_v20, %s3507_s23 }
 0x16f   : > { %1107 = vrot.lane.b32.xlu0 %v3788_v20, %s3508_s28  ;;  %1105 = vrot.lane.b32.xlu1 %v3774_v17, %s3508_s28 }
 0x173   : > { %1111 = vrot.lane.b32.xlu0 %v3792_v22, %s3508_s28  ;;  %1109 = vrot.lane.b32.xlu1 %v3776_v18, %s3508_s28 }
 0x177   : > { %1156 = vrot.lane.b32.xlu0 %v3788_v20, %s3509_s20  ;;  %1154 = vrot.lane.b32.xlu1 %v3774_v17, %s3509_s20 }
 0x17b   : > { %1160 = vrot.lane.b32.xlu0 %v3792_v22, %s3509_s20  ;;  %1158 = vrot.lane.b32.xlu1 %v3776_v18, %s3509_s20 }
 0x17f   : > { %1243 = vperm.xlu1 %3259, %v1240_v23   ;;  %v2905_v23 = vld [vmem:[%s4358_s1 + $0x3] ss:$8 sm:$0xf] }
 0x1b1   : > { %v816_v24 = vpop.permute.xlu0 %815  ;;  %v812_v25 = vpop.permute.xlu1 %811 }
 0x1b5   : > { %v860_v26 = vpop.permute.xlu0 %859  ;;  %v3819_v27 = vpop.permute.xlu1 %1007 }
 0x1b9   : > { %v864_v28 = vpop.permute.xlu0 %863  ;;  %v3821_v29 = vpop.permute.xlu1 %1011 }
 0x1bd   : > { %v3823_v30 = vpop.permute.xlu0 %908  ;;  %v3825_v31 = vpop.permute.xlu1 %1056 }
 0x1c1   : > { %v3827_v33 = vpop.permute.xlu0 %912  ;;  %v3829_v34 = vpop.permute.xlu1 %1060 }
 0x1c5   : > { %v3833_v36 = vpop.permute.xlu0 %957  ;;  %v814_v40 = vpop.permute.xlu1 %813 }
 0x1c6   : > { %v818_v50 = vsel %vm817_vm2, %v812_v25, %v814_v40  ;;  %v819_v51 = vsel %vm817_vm2, %v814_v40, %v816_v24  ;;  %v941_v40 = vrot.slane %v2904_v21, %v3845_v41 }
 0x1c7   : > { %v849_v58 = vmul.f32 %v835_v44, %v818_v50  ;;  %v850_v59 = vmul.f32 %v839_v45, %v819_v51  ;;  %v1043_v44 = vrot.slane %v3874_v19, %v3845_v41  ;;  %v990_v45 = vrot.slane %v2905_v23, %v3845_v41 }
 0x1c8   : > { %v1084_v50 = vrot.slane %v3891_v42, %v3839_v38 }
 0x1c9   : > { %v3855_v46 = vpop.permute.xlu0 %961  ;;  %v857_v49 = vpop.permute.xlu1 %856 }
 0x1ca   : > { %v868_v52 = vsel %vm865_vm3, %v864_v28, %v857_v49  ;;  %v873_v53 = vsel %vm865_vm3, %v857_v49, %v860_v26  ;;  %v937_v49 = vrot.slane %v2904_v21, %v3842_v39 }
 0x1cb   : > { %v897_v60 = vmul.f32 %v880_v47, %v873_v53  ;;  %v900_v61 = vmul.f32 %v892_v48, %v868_v52  ;;  %v933_v48 = vrot.slane %v2904_v21, %v3839_v38  ;;  %v978_v52 = vrot.slane %v2905_v23, %v3836_v37 }
 0x1cd   : > { %v806_v62 = vpop.permute.xlu0 %805  ;;  %v862_v63 = vpop.permute.xlu1 %861 }
 0x1ce   : > { %v820_v0 = vsel %vm817_vm2, %v816_v24, %v806_v62  ;;  %v825_v1 = vsel %vm817_vm2, %v806_v62, %v812_v25  ;;  %v866_v2 = vsel %vm865_vm3, %v860_v26, %v862_v63  ;;  %v867_v3 = vsel %vm865_vm3, %v862_v63, %v864_v28 }
 0x1cf   : > { %v848_v4 = vmul.f32 %v831_v54, %v825_v1  ;;  %v851_v8 = vmul.f32 %v843_v55, %v820_v0  ;;  %v898_v9 = vmul.f32 %v884_v56, %v866_v2  ;;  %v899_v10 = vmul.f32 %v888_v57, %v867_v3 }
 0x1d0   : > { %v1031_v26 = vrot.slane %v3874_v19, %v3836_v37  ;;  %v1035_v28 = vrot.slane %v3874_v19, %v3839_v38  ;;  %v1088_v54 = vrot.slane %v3891_v42, %v3842_v39  ;;  %v1092_v55 = vrot.slane %v3891_v42, %v3845_v41 }
 0x1d1   : > { %v3087_v11 = vpack.c.bf16 %v897_v60, %v848_v4  ;;  %v3103_v12 = vpack.c.bf16 %v899_v10, %v850_v59  ;;  %v1010_v13 = vpop.permute.xlu0 %1009  ;;  %v906_v14 = vpop.permute.xlu1 %905  ;;  %v3085_v15 = vpack.c.bf16 %v898_v9, %v849_v58  ;;  %v3101_v16 = vpack.c.bf16 %v900_v61, %v851_v8 }
 0x1d2   : > { %v917_v47 = vsel %vm914_vm5, %v3827_v33, %v906_v14  ;;  %v1017_v56 = vsel %vm1015_vm4, %v1010_v13, %v3821_v29  ;;  %v982_v58 = vrot.slane %v2905_v23, %v3839_v38  ;;  %v986_v59 = vrot.slane %v2905_v23, %v3842_v39 }
 0x1d3   : > { %3086 = vmatprep.subr.bf16.mxu0 %v3085_v15  ;;  %3102 = vmatprep.subr.bf16.mxu1 %v3101_v16  ;;  %v949_v60 = vmul.f32 %v941_v40, %v917_v47  ;;  %v1016_v0 = vsel %vm1015_vm4, %v3819_v27, %v1010_v13  ;;  %v1049_v3 = vmul.f32 %v1035_v28, %v1017_v56 }
 0x1d4   : > { %3088 = vmatpush1.bf16.msra.mxu0 %v3087_v11  ;;  %3104 = vmatpush1.bf16.msra.mxu1 %v3103_v12  ;;  %v922_v4 = vsel %vm914_vm5, %v906_v14, %v3823_v30 }
 0x1d5   : > { %v1014_v24 = vpop.permute.xlu0 %1013  ;;  %v911_v25 = vpop.permute.xlu1 %910  ;;  %v946_v21 = vmul.f32 %v929_v32, %v922_v4 }
 0x1d6   : > { %v1024_v61 = vsel %vm1015_vm4, %v1014_v24, %v3819_v27  ;;  %v915_v1 = vsel %vm914_vm5, %v3823_v30, %v911_v25  ;;  %v916_v2 = vsel %vm914_vm5, %v911_v25, %v3827_v33  ;;  %v1018_v8 = vsel %vm1015_vm4, %v3821_v29, %v1014_v24  ;;  %v2908_v27 = vld [vmem:[%s4358_s1 + $0x6] ss:$8 sm:$0xf] }
 0x1d7   : > { %v1051_v12 = vmul.f32 %v1043_v44, %v1024_v61  ;;  %v947_v16 = vmul.f32 %v933_v48, %v915_v1  ;;  %v948_v30 = vmul.f32 %v937_v49, %v916_v2  ;;  %v1048_v29 = vmul.f32 %v1031_v26, %v1016_v0 }
 0x1d8   : > { %v1129_v23 = vrot.slane %v2908_v27, %v3836_v37  ;;  %v1141_v24 = vrot.slane %v2908_v27, %v3845_v41  ;;  %v1050_v25 = vmul.f32 %v1039_v43, %v1018_v8  ;;  %v3093_v43 = vpack.c.bf16 %v1049_v3, %v3788_v20 }
 0x1d9   : > { %v1059_v51 = vpop.permute.xlu0 %1058  ;;  %v955_v53 = vpop.permute.xlu1 %954  ;;  %v3109_v26 = vpack.c.bf16 %v1051_v12, %v3792_v22  ;;  %v1137_v49 = vrot.slane %v2908_v27, %v3842_v39 }
 0x1da   : > { %v966_v57 = vsel %vm963_vm6, %v3855_v46, %v955_v53  ;;  %v971_v62 = vsel %vm963_vm6, %v955_v53, %v3833_v36  ;;  %v1080_v53 = vrot.slane %v3891_v42, %v3836_v37  ;;  %v3111_v22 = vpack.c.bf16 %v1050_v25, %v3776_v18 }
 0x1db   : > { %v998_v63 = vmul.f32 %v990_v45, %v966_v57  ;;  %v995_v13 = vmul.f32 %v978_v52, %v971_v62  ;;  %v3095_v52 = vpack.c.bf16 %v1048_v29, %v3774_v17  ;;  %v1429_v29 = vld [vmem:[%s4359_s2 + $0x108] sm:$0xff] }
 0x1dd   : > { %v1063_v9 = vpop.permute.xlu0 %1062  ;;  %v960_v10 = vpop.permute.xlu1 %959  ;;  %v3105_v11 = vpack.c.bf16 %v998_v63, %v949_v60  ;;  %v3091_v47 = vpack.c.bf16 %v995_v13, %v946_v21  ;;  %v1445_v13 = vld [vmem:[%s4359_s2 + $0x188] sm:$0xff]  ;;  %v1414_v21 = vld [vmem:[%s4359_s2 + $0x90] sm:$0xff] }
 0x1de   : > { %v964_v33 = vsel %vm963_vm6, %v3833_v36, %v960_v10  ;;  %v965_v15 = vsel %vm963_vm6, %v960_v10, %v3855_v46  ;;  %v1133_v36 = vrot.slane %v2908_v27, %v3839_v38  ;;  %v1066_v46 = vsel %vm1064_vm7, %v1059_v51, %v3829_v34  ;;  %v1413_v27 = vld [vmem:[%s4359_s2 + $0x88] sm:$0xff] }
 0x1df   : > { %v996_v14 = vmul.f32 %v982_v58, %v964_v33  ;;  %v997_v19 = vmul.f32 %v986_v59, %v965_v15  ;;  %3106 = vmatprep.subr.bf16.mxu1 %v3105_v11  ;;  %v1067_v48 = vsel %vm1064_vm7, %v3829_v34, %v1063_v9  ;;  %v1073_v56 = vsel %vm1064_vm7, %v1063_v9, %v3825_v31  ;;  %v1412_v11 = vld [vmem:[%s4359_s2 + $0x80] sm:$0xff]  ;;  %v1397_v15 = vld [vmem:[%s4359_s2 + $0x8] sm:$0xff] }
 0x1e0   : > { %v1065_v34 = vsel %vm1064_vm7, %v3825_v31, %v1059_v51  ;;  %v1098_v57 = vmul.f32 %v1084_v50, %v1066_v46  ;;  %v1099_v58 = vmul.f32 %v1088_v54, %v1067_v48  ;;  %v1100_v63 = vmul.f32 %v1092_v55, %v1073_v56  ;;  %v2909_v54 = vld [vmem:[%s4358_s1 + $0x7] ss:$8 sm:$0xf] }
 0x1e1   : > { %v3107_v28 = vpack.c.bf16 %v997_v19, %v948_v30  ;;  %v1108_v40 = vpop.permute.xlu0 %1107  ;;  %v1106_v44 = vpop.permute.xlu1 %1105  ;;  %v3089_v45 = vpack.c.bf16 %v996_v14, %v947_v16  ;;  %v1097_v31 = vmul.f32 %v1080_v53, %v1065_v34  ;;  %v1190_v42 = vrot.slane %v2909_v54, %v3845_v41  ;;  %v1444_v41 = vld [vmem:[%s4359_s2 + $0x180] sm:$0xff]  ;;  %v1430_v53 = vld [vmem:[%s4359_s2 + $0x110] sm:$0xff]  ;;  %v1431_v56 = vld [vmem:[%s4359_s2 + $0x118] sm:$0xff] }
 0x1e2   : > { %v1114_v32 = vsel %vm1113_vm8, %v1106_v44, %v1108_v40  ;;  %v1182_v55 = vrot.slane %v2909_v54, %v3839_v38  ;;  %v1186_v9 = vrot.slane %v2909_v54, %v3842_v39  ;;  %v1178_v10 = vrot.slane %v2909_v54, %v3836_v37  ;;  %v1396_v33 = vld [vmem:[%s4359_s2] sm:$0xff]  ;;  %v1417_v34 = vld [vmem:[%s4359_s2 + $0xa8] sm:$0xff] }
 0x1e3   : > { %3090 = vmatprep.subr.bf16.mxu0 %v3089_v45  ;;  %3108 = vmatpush1.bf16.msra.mxu1 %v3107_v28  ;;  %v1146_v60 = vmul.f32 %v1129_v23, %v1114_v32  ;;  %v1428_v19 = vld [vmem:[%s4359_s2 + $0x100] sm:$0xff]  ;;  %v1415_v28 = vld [vmem:[%s4359_s2 + $0x98] sm:$0xff]  ;;  %v3117_v46 = vpack.c.bf16 %v1413_v27, %v1412_v11  ;;  %v3119_v48 = vpack.c.bf16 %v1397_v15, %v1396_v33  ;;  %v1398_v32 = vld [vmem:[%s4359_s2 + $0x10] sm:$0xff] }
 0x1e4   : > { %3092 = vmatpush1.bf16.msra.mxu0 %v3091_v47  ;;  %3110 = vmatprep.subr.bf16.mxu1 %v3109_v26  ;;  %v3149_v47 = vpack.c.bf16 %v1445_v13, %v1444_v41  ;;  %v3151_v26 = vpack.c.bf16 %v1429_v29, %v1428_v19  ;;  %v1452_v11 = vld [vmem:[%s4359_s2 + $0x1c0] sm:$0xff]  ;;  %v1453_v27 = vld [vmem:[%s4359_s2 + $0x1c8] sm:$0xff]  ;;  %v1454_v19 = vld [vmem:[%s4359_s2 + $0x1d0] sm:$0xff] }
 0x1e5   : > { %v1112_v20 = vpop.permute.xlu0 %1111  ;;  %3094 = vmatprep.subr.bf16.mxu0 %v3093_v43  ;;  %v1110_v59 = vpop.permute.xlu1 %1109  ;;  %v3099_v8 = vpack.c.bf16 %v1146_v60, %v1097_v31  ;;  %v1399_v43 = vld [vmem:[%s4359_s2 + $0x18] sm:$0xff]  ;;  %v1400_v60 = vld [vmem:[%s4359_s2 + $0x20] sm:$0xff]  ;;  %v1450_v31 = vld [vmem:[%s4359_s2 + $0x1b0] sm:$0xff]  ;;  %v3165_v33 = vpack.c.bf16 %v1453_v27, %v1452_v11 }
 0x1e6   : > { %v1122_v17 = vsel %vm1113_vm8, %v1112_v20, %v1106_v44  ;;  %v1115_v61 = vsel %vm1113_vm8, %v1108_v40, %v1110_v59  ;;  %v1116_v62 = vsel %vm1113_vm8, %v1110_v59, %v1112_v20  ;;  %v1446_v40 = vld [vmem:[%s4359_s2 + $0x190] sm:$0xff]  ;;  %v1447_v44 = vld [vmem:[%s4359_s2 + $0x198] sm:$0xff]  ;;  %v3123_v20 = vpack.c.bf16 %v1399_v43, %v1398_v32  ;;  %v1436_v15 = vld [vmem:[%s4359_s2 + $0x140] sm:$0xff] }
 0x1e7   : > { %v1149_v18 = vmul.f32 %v1141_v24, %v1122_v17  ;;  %v1147_v0 = vmul.f32 %v1133_v36, %v1115_v61  ;;  %v1148_v1 = vmul.f32 %v1137_v49, %v1116_v62  ;;  %3112 = vmatpush1.bf16.msra.mxu1 %v3111_v22  ;;  %v1203_v36 = vld [vmem:[%s603_s11] sm:$0xff]  ;;  %v3121_v49 = vpack.c.bf16 %v1415_v28, %v1414_v21  ;;  %v1401_v17 = vld [vmem:[%s4359_s2 + $0x28] sm:$0xff]  ;;  %v1455_v29 = vld [vmem:[%s4359_s2 + $0x1d8] sm:$0xff] }
 0x1e8   : > { %3096 = vmatpush1.bf16.msra.mxu0 %v3095_v52  ;;  %v3153_v52 = vpack.c.bf16 %v1447_v44, %v1446_v40  ;;  %v1416_v22 = vld [vmem:[%s4359_s2 + $0xa0] sm:$0xff]  ;;  %v3155_v59 = vpack.c.bf16 %v1431_v56, %v1430_v53  ;;  %v3169_v40 = vpack.c.bf16 %v1455_v29, %v1454_v19  ;;  %v1438_v44 = vld [vmem:[%s4359_s2 + $0x150] sm:$0xff]  ;;  %v1409_v53 = vld [vmem:[%s4359_s2 + $0x68] sm:$0xff] }
 0x1e9   : > { %v3115_v50 = vpack.c.bf16 %v1148_v1, %v1099_v58  ;;  %v1157_v51 = vpop.permute.xlu0 %1156  ;;  %v1155_v2 = vpop.permute.xlu1 %1154  ;;  %v3097_v3 = vpack.c.bf16 %v1147_v0, %v1098_v57  ;;  %v3113_v4 = vpack.c.bf16 %v1149_v18, %v1100_v63  ;;  %v1448_v57 = vld [vmem:[%s4359_s2 + $0x1a0] sm:$0xff]  ;;  %v1449_v58 = vld [vmem:[%s4359_s2 + $0x1a8] sm:$0xff]  ;;  %v3125_v61 = vpack.c.bf16 %v1417_v34, %v1416_v22  ;;  %v1418_v0 = vld [vmem:[%s4359_s2 + $0xb0] sm:$0xff] }
 0x1ea   : > { %v1163_v38 = vsel %vm1162_vm9, %v1155_v2, %v1157_v51  ;;  %v3157_v62 = vpack.c.bf16 %v1449_v58, %v1448_v57  ;;  %v1432_v63 = vld [vmem:[%s4359_s2 + $0x120] sm:$0xff]  ;;  %v1433_v18 = vld [vmem:[%s4359_s2 + $0x128] sm:$0xff]  ;;  %v1419_v1 = vld [vmem:[%s4359_s2 + $0xb8] sm:$0xff] }
 0x1eb   : > { %3098 = vmatprep.subr.bf16.mxu0 %v3097_v3  ;;  %3114 = vmatprep.subr.bf16.mxu1 %v3113_v4  ;;  %v1195_v45 = vmul.f32 %v1178_v10, %v1163_v38  ;;  %v3159_v54 = vpack.c.bf16 %v1433_v18, %v1432_v63  ;;  %v1403_v3 = vld [vmem:[%s4359_s2 + $0x38] sm:$0xff]  ;;  %v3129_v4 = vpack.c.bf16 %v1419_v1, %v1418_v0  ;;  %v1421_v10 = vld [vmem:[%s4359_s2 + $0xc8] sm:$0xff]  ;;  %v1440_v56 = vld [vmem:[%s4359_s2 + $0x160] sm:$0xff] }
 0x1ec   : > { %3100 = vmatpush1.bf16.msra.mxu0 %v3099_v8  ;;  %3116 = vmatpush1.bf16.msra.mxu1 %v3115_v50  ;;  %v1451_v50 = vld [vmem:[%s4359_s2 + $0x1b8] sm:$0xff]  ;;  %v1441_v34 = vld [vmem:[%s4359_s2 + $0x168] sm:$0xff]  ;;  %v1426_v58 = vld [vmem:[%s4359_s2 + $0xf0] sm:$0xff] }
 0x1ed   : > { %v1161_v12 = vpop.permute.xlu0 %1160  ;;  %v1159_v39 = vpop.permute.xlu1 %1158  ;;  %v3161_v8 = vpack.c.bf16 %v1451_v50, %v1450_v31  ;;  %v3175_v57 = vpack.c.bf16 %v1441_v34, %v1440_v56  ;;  %v1442_v0 = vld [vmem:[%s4359_s2 + $0x170] sm:$0xff]  ;;  %v1443_v1 = vld [vmem:[%s4359_s2 + $0x178] sm:$0xff] }
 0x1ee   : > { %v1171_v16 = vsel %vm1162_vm9, %v1161_v12, %v1155_v2  ;;  %v1164_v30 = vsel %vm1162_vm9, %v1157_v51, %v1159_v39  ;;  %v1165_v14 = vsel %vm1162_vm9, %v1159_v39, %v1161_v12  ;;  %v3127_v51 = vpack.c.bf16 %v1401_v17, %v1400_v60  ;;  %v1402_v2 = vld [vmem:[%s4359_s2 + $0x30] sm:$0xff]  ;;  %v1404_v12 = vld [vmem:[%s4359_s2 + $0x40] sm:$0xff]  ;;  %v1405_v39 = vld [vmem:[%s4359_s2 + $0x48] sm:$0xff] }
 0x1ef   : > { %v1198_v23 = vmul.f32 %v1190_v42, %v1171_v16  ;;  %v1196_v24 = vmul.f32 %v1182_v55, %v1164_v30  ;;  %v1197_v25 = vmul.f32 %v1186_v9, %v1165_v14  ;;  %v1434_v42 = vld [vmem:[%s4359_s2 + $0x130] sm:$0xff]  ;;  %v1435_v55 = vld [vmem:[%s4359_s2 + $0x138] sm:$0xff]  ;;  %v1420_v9 = vld [vmem:[%s4359_s2 + $0xc0] sm:$0xff]  ;;  %v3131_v41 = vpack.c.bf16 %v1403_v3, %v1402_v2 }
 0x1f0   : > { %v3163_v38 = vpack.c.bf16 %v1435_v55, %v1434_v42  ;;  %v3133_v13 = vpack.c.bf16 %v1421_v10, %v1420_v9  ;;  %v1437_v16 = vld [vmem:[%s4359_s2 + $0x148] sm:$0xff]  ;;  %v1422_v30 = vld [vmem:[%s4359_s2 + $0xd0] sm:$0xff]  ;;  %v1423_v14 = vld [vmem:[%s4359_s2 + $0xd8] sm:$0xff]  ;;  %v3135_v21 = vpack.c.bf16 %v1405_v39, %v1404_v12  ;;  %v3179_v31 = vpack.c.bf16 %v1443_v1, %v1442_v0 }
 0x1f1   : > { %1266 = vmatprep.subr.mxu0 %v1196_v24  ;;  %1337 = vmatprep.subr.mxu1 %v1198_v23  ;;  %v3167_v23 = vpack.c.bf16 %v1437_v16, %v1436_v15  ;;  %v1406_v24 = vld [vmem:[%s4359_s2 + $0x50] sm:$0xff]  ;;  %v3137_v28 = vpack.c.bf16 %v1423_v14, %v1422_v30  ;;  %v1459_v17 = vld [vmem:[%s4359_s2 + $0x1f8] sm:$0xff]  ;;  %v2541_v12 = vld [vmem:[%s3750_s16] sm:$0xf]  ;;  %v3510_v39 = vmov 0.0|0.0  }
 0x1f2   : > { %1267 = vmatpush1.msra.mxu0 %v1195_v45  ;;  %1338 = vmatpush1.msra.mxu1 %v1197_v25  ;;  %v1407_v25 = vld [vmem:[%s4359_s2 + $0x58] sm:$0xff] }
 0x1f3   : > { %2910 = vmatmul.mubr.msk.f32.vlgmr.msra.gmra.mrb[2].mxu0 %vm1246_vm10, %v1203_v36  ;;  %2911 = vmatmul.mubr.msk.f32.vlgmr.msra.gmra.mrb[2].mxu1 %vm1246_vm10, %v1203_v36  ;;  %v1439_v45 = vld [vmem:[%s4359_s2 + $0x158] sm:$0xff]  ;;  %v1424_v36 = vld [vmem:[%s4359_s2 + $0xe0] sm:$0xff] }
 0x1f4   : > { %3118 = vmatprep.subr.bf16.mxu0 %v3117_v46  ;;  %3150 = vmatprep.subr.bf16.mxu1 %v3149_v47  ;;  %v1425_v46 = vld [vmem:[%s4359_s2 + $0xe8] sm:$0xff]  ;;  %v1456_v47 = vld [vmem:[%s4359_s2 + $0x1e0] sm:$0xff]  ;;  %v3171_v32 = vpack.c.bf16 %v1439_v45, %v1438_v44 }
 0x1f5   : > { %3120 = vmatpush3.bf16.msra.mxu0 %v3119_v48  ;;  %3152 = vmatpush3.bf16.msra.mxu1 %v3151_v26  ;;  %v1457_v48 = vld [vmem:[%s4359_s2 + $0x1e8] sm:$0xff]  ;;  %v3139_v26 = vpack.c.bf16 %v1407_v25, %v1406_v24  ;;  %v3141_v43 = vpack.c.bf16 %v1425_v46, %v1424_v36  ;;  %v1607_v25 = vld [vmem:[%s3736_s3] sm:$0x3]  ;;  %s4404_s3 = sld [smem:[#allocation16_spill]]  ;;  %v3512_v46 = vmov 1983009808  }
 0x1f6   : > { %3122 = vmatprep.subr.bf16.mxu0 %v3121_v49  ;;  %3154 = vmatprep.subr.bf16.mxu1 %v3153_v52  ;;  %v3173_v49 = vpack.c.bf16 %v1457_v48, %v1456_v47  ;;  %v1408_v52 = vld [vmem:[%s4359_s2 + $0x60] sm:$0xff]  ;;  %v1771_v47 = vunpack.c.l.s4 %v3512_v46 }
 0x1f7   : > { %v3143_v22 = vpack.c.bf16 %v1409_v53, %v1408_v52  ;;  %v1682_v45 = vld [vmem:[%s615_s24] sm:$0xff]  ;;  %s2490_s24 = sld [smem:[#allocation7 + %s2986_s15]] }
 0x1f8   : > { %v1767_v36 = vld [vmem:[%s4405_s19] sm:$0xff]  ;;  %v1772_v48 = vunpack.c.0.s8 %v1771_v47 }
 0x1f9   : > { %3124 = vmatpush3.bf16.msra.mxu0 %v3123_v20  ;;  %3156 = vmatpush3.bf16.msra.mxu1 %v3155_v59  ;;  %v1427_v20 = vld [vmem:[%s4359_s2 + $0xf8] sm:$0xff]  ;;  %v1458_v59 = vld [vmem:[%s4359_s2 + $0x1f0] sm:$0xff] }
 0x1fa   : > { %3126 = vmatprep.subr.bf16.mxu0 %v3125_v61  ;;  %3158 = vmatprep.subr.bf16.mxu1 %v3157_v62  ;;  %v3145_v60 = vpack.c.bf16 %v1427_v20, %v1426_v58  ;;  %v1410_v61 = vld [vmem:[%s4359_s2 + $0x70] sm:$0xff]  ;;  %v1411_v62 = vld [vmem:[%s4359_s2 + $0x78] sm:$0xff]  ;;  %v3177_v63 = vpack.c.bf16 %v1459_v17, %v1458_v59 }
 0x1fb   : > { %v3147_v18 = vpack.c.bf16 %v1411_v62, %v1410_v61  ;;  %v3265_v56 = vld [vmem:[%s4404_s3 + $0x104] ss:$8 sps:$4 sm:$0xff]   ;;  %v3263_v59 = vld [vmem:[%s4404_s3 + $0x100] ss:$8 sps:$4 sm:$0xff]   ;;  %v3271_v17 = vld [vmem:[%s4404_s3 + $0x114] ss:$8 sps:$4 sm:$0xff]  }
 0x1fc   : > { %v3274_v61 = vld [vmem:[%s4404_s3 + $0x14] ss:$8 sps:$4 sm:$0xff]   ;;  %v3277_v0 = vld [vmem:[%s4404_s3 + $0x124] ss:$8 sps:$4 sm:$0xff]   ;;  %v3323_v46 = vld [vmem:[%s4404_s3 + $0x1a0] ss:$8 sps:$4 sm:$0xff]  }
 0x1fd   : > { %3128 = vmatpush3.bf16.msra.mxu0 %v3127_v51  ;;  %3160 = vmatpush3.bf16.msra.mxu1 %v3159_v54  ;;  %v3280_v1 = vld [vmem:[%s4404_s3 + $0x24] ss:$8 sps:$4 sm:$0xff]  }
 0x1fe   : > { %3130 = vmatprep.subr.bf16.mxu0 %v3129_v4  ;;  %3162 = vmatprep.subr.bf16.mxu1 %v3161_v8  ;;  %v1244_v50 = vpop.permute.xlu1 %1243  ;;  %v3328_v47 = vld [vmem:[%s4404_s3 + $0xa4] ss:$8 sps:$4 sm:$0xff]  }
 0x201   : > { %3132 = vmatpush3.bf16.msra.mxu0 %v3131_v41  ;;  %3164 = vmatpush3.bf16.msra.mxu1 %v3163_v38 }
 0x202   : > { %3134 = vmatprep.subr.bf16.mxu0 %v3133_v13  ;;  %3166 = vmatprep.subr.bf16.mxu1 %v3165_v33 }
 0x205   : > { %3136 = vmatpush3.bf16.msra.mxu0 %v3135_v21  ;;  %3168 = vmatpush3.bf16.msra.mxu1 %v3167_v23 }
 0x206   : > { %3138 = vmatprep.subr.bf16.mxu0 %v3137_v28  ;;  %3170 = vmatprep.subr.bf16.mxu1 %v3169_v40 }
 0x209   : > { %3140 = vmatpush3.bf16.msra.mxu0 %v3139_v26  ;;  %3172 = vmatpush3.bf16.msra.mxu1 %v3171_v32  ;;  %v1769_v26 = vcombine.high %v1767_v36, %v1767_v36  ;;  %v1775_v32 = vsub.s32 %v1772_v48, %v3831_v35  ;;  %v3326_v48 = vld [vmem:[%s4404_s3 + $0xa0] ss:$8 sps:$4 sm:$0xff]  }
 0x20a   : > { %3142 = vmatprep.subr.bf16.mxu0 %v3141_v43  ;;  %3174 = vmatprep.subr.bf16.mxu1 %v3173_v49 }
 0x20b   : > { %v1776_v43 = vrot.slane %v1767_v36, %v1775_v32  ;;  %v1783_v49 = vrot.slane %v1769_v26, %v1775_v32  ;;  %v3325_v36 = vld [vmem:[%s4404_s3 + $0x1a4] ss:$8 sps:$4 sm:$0xff]   ;;  %v3331_v26 = vld [vmem:[%s4404_s3 + $0x1b4] ss:$8 sps:$4 sm:$0xff]   ;;  %v3329_v32 = vld [vmem:[%s4404_s3 + $0x1b0] ss:$8 sps:$4 sm:$0xff]  }
 0x20d   : > { %3144 = vmatpush3.bf16.msra.mxu0 %v3143_v22  ;;  %3176 = vmatpush3.bf16.msra.mxu1 %v3175_v57  ;;  %v1784_v52 = vcombine.high %v1776_v43, %v1776_v43  ;;  %v1785_v53 = vcombine.high %v1783_v49, %v1783_v49  ;;  %v3268_v22 = vld [vmem:[%s4404_s3 + $0x4] ss:$8 sps:$4 sm:$0xff]  }
 0x20e   : > { %3146 = vmatprep.subr.bf16.mxu0 %v3145_v60  ;;  %3178 = vmatprep.subr.bf16.mxu1 %v3177_v63  ;;  %v3266_v60 = vld [vmem:[%s4404_s3] ss:$8 sps:$4 sm:$0xff]   ;;  %v3269_v63 = vld [vmem:[%s4404_s3 + $0x110] ss:$8 sps:$4 sm:$0xff]  }
 0x211   : > { %3148 = vmatpush3.bf16.msra.mxu0 %v3147_v18  ;;  %3180 = vmatpush3.bf16.msra.mxu1 %v3179_v31  ;;  %v3272_v18 = vld [vmem:[%s4404_s3 + $0x10] ss:$8 sps:$4 sm:$0xff]   ;;  %v3275_v31 = vld [vmem:[%s4404_s3 + $0x120] ss:$8 sps:$4 sm:$0xff]  }
 0x212   : > { %3181 = vmatprep.subr.bf16.mxu0 %v3510_v39  ;;  %2919 = vmatprep.subr.msk.mxu1 %vm1687_vm12, %v1785_v53  ;;  %v3296_v39 = vld [vmem:[%s4404_s3 + $0x50] ss:$8 sps:$4 sm:$0xff]   ;;  %v3335_v53 = vld [vmem:[%s4404_s3 + $0x1c0] ss:$8 sps:$4 sm:$0xff]  }
 0x2c6   : > { %v1316_v51 = vpop.f32.mrb[2].mxu0  ;;  %v1387_v54 = vpop.f32.mrb[2].mxu1 }
 0x2c7   : > { %v1317_v2 = vadd.f32 %v1316_v51, %v1244_v50  ;;  %v1388_v3 = vadd.f32 %v1387_v54, %v1244_v50  ;;  %v1318_v4 = vpop.f32.mrb[3].mxu0  ;;  %v1389_v8 = vpop.f32.mrb[3].mxu1  ;;  %v3283_v51 = vld [vmem:[%s4404_s3 + $0x134] ss:$8 sps:$4 sm:$0xff]  }
 0x2c8   : > { %v1319_v42 = vadd.f32 %v1318_v4, %v1244_v50  ;;  %v1390_v55 = vadd.f32 %v1389_v8, %v1244_v50  ;;  %v3278_v50 = vld [vmem:[%s4404_s3 + $0x20] ss:$8 sps:$4 sm:$0xff]   ;;  %v3286_v54 = vld [vmem:[%s4404_s3 + $0x34] ss:$8 sps:$4 sm:$0xff]   ;;  %v3289_v4 = vld [vmem:[%s4404_s3 + $0x144] ss:$8 sps:$4 sm:$0xff]  }
 0x2c9   : > { %v4171_v9 = vmax.f32 %v1317_v2, 0.0  ;;  %v4173_v10 = vmax.f32 %v1388_v3, 0.0  ;;  %v3281_v2 = vld [vmem:[%s4404_s3 + $0x130] ss:$8 sps:$4 sm:$0xff]   ;;  %v3292_v8 = vld [vmem:[%s4404_s3 + $0x44] ss:$8 sps:$4 sm:$0xff]  }
 0x2ca   : > { %v4175_v11 = vmax.f32 %v1319_v42, 0.0  ;;  %v4177_v27 = vmax.f32 %v1390_v55, 0.0  ;;  %v3284_v3 = vld [vmem:[%s4404_s3 + $0x30] ss:$8 sps:$4 sm:$0xff]   ;;  %v3287_v42 = vld [vmem:[%s4404_s3 + $0x140] ss:$8 sps:$4 sm:$0xff]  }
 0x2cb   : > { %v3290_v55 = vld [vmem:[%s4404_s3 + $0x40] ss:$8 sps:$4 sm:$0xff]  }
 0x2cc   : > { %1524 = vmatprep.mubr.f32.mxu0 %v4175_v11  ;;  %1594 = vmatprep.mubr.f32.mxu1 %v4177_v27  ;;  %v1603_v41 = vmax.f32 %v4173_v10, %v4177_v27  ;;  %v1600_v38 = vmax.f32 %v4171_v9, %v4175_v11 }
 0x2cd   : > { %1525 = vmatmul.mubr.f32.vlgmr.msra.gmra.mrb[4].mxu0 %v4171_v9  ;;  %1595 = vmatmul.mubr.f32.vlgmr.msra.gmra.mrb[4].mxu1 %v4173_v10 }
 0x2ce   : > { %1604 = vmax.xlane.f32.xlu1 %v1603_v41  ;;  %1601 = vmax.xlane.f32.xlu0 %v1600_v38  ;;  %v3295_v41 = vld [vmem:[%s4404_s3 + $0x154] ss:$8 sps:$4 sm:$0xff]  }
 0x2cf   : > { %1932 = vmatprep.mubr.f32.mxu1 %v3500_v7  ;;  %3077 = vmatprep.mubr.msk.f32.mxu0 %vm3511_vm11, %v3500_v7  ;;  %v3298_v38 = vld [vmem:[%s4404_s3 + $0x54] ss:$8 sps:$4 sm:$0xff]  }
 0x2d0   : > { %2920 = vmatpush1.msk.msra.mxu1 %vm1687_vm12, %v1783_v49  ;;  %v3332_v49 = vld [vmem:[%s4404_s3 + $0xb0] ss:$8 sps:$4 sm:$0xff]  }
 0x2d1   : > { %2401 = vmatprep.subr.bf16.mxu1 %v3268_v22  ;;  %v3338_v22 = vld [vmem:[%s4404_s3 + $0xc0] ss:$8 sps:$4 sm:$0xff]  }
 0x2e4   : > { %2544 = vperm.xlu0 %3258, %v2541_v12   ;;  %v3293_v12 = vld [vmem:[%s4404_s3 + $0x150] ss:$8 sps:$4 sm:$0xff]  }
 0x35b   : > { %v1605_v30 = vpop.xlane.xlu1 %1604  ;;  %v1602_v14 = vpop.xlane.xlu0 %1601 }
 0x35c   : > { %v1606_v23 = vsel %vm963_vm6, %v1602_v14, %v1605_v30  ;;  %v3307_v30 = vld [vmem:[%s4404_s3 + $0x174] ss:$8 sps:$4 sm:$0xff]  }
 0x35d   : > { %v3310_v14 = vld [vmem:[%s4404_s3 + $0x74] ss:$8 sps:$4 sm:$0xff]  }
 0x3a0   : > { %v3030_v13 = vpop.f32.mrb[4].mxu0  ;;  %v3065_v33 = vpop.f32.mrb[4].mxu1 }
 0x3a1   : > { %v3031_v15 = vpop.f32.mrb[5].mxu0  ;;  %v3066_v16 = vpop.f32.mrb[5].mxu1 }
 0x3a2   : > { %v3032_v19 = vadd.f32 %v3031_v15, %v3030_v13  ;;  %v3067_v29 = vadd.f32 %v3066_v16, %v3065_v33  ;;  %v3301_v13 = vld [vmem:[%s4404_s3 + $0x164] ss:$8 sps:$4 sm:$0xff]   ;;  %v3299_v15 = vld [vmem:[%s4404_s3 + $0x160] ss:$8 sps:$4 sm:$0xff]  }
 0x3a3   : > { %v3304_v33 = vld [vmem:[%s4404_s3 + $0x64] ss:$8 sps:$4 sm:$0xff]   ;;  %v3302_v16 = vld [vmem:[%s4404_s3 + $0x60] ss:$8 sps:$4 sm:$0xff]  }
 0x3a4   : > { %v1597_v21 = vadd.f32 %v3067_v29, %v3032_v19  ;;  %v3305_v19 = vld [vmem:[%s4404_s3 + $0x170] ss:$8 sps:$4 sm:$0xff]  }
 0x3a5   : > { %v3308_v29 = vld [vmem:[%s4404_s3 + $0x70] ss:$8 sps:$4 sm:$0xff]  }
 0x3a6   : > { %v3182_v24 = vpack.c.bf16 %v1606_v23, %v1597_v21  ;;  %v3313_v21 = vld [vmem:[%s4404_s3 + $0x184] ss:$8 sps:$4 sm:$0xff]  }
 0x3a7   : > { %v3316_v23 = vld [vmem:[%s4404_s3 + $0x84] ss:$8 sps:$4 sm:$0xff]  }
 0x3a8   : > { %3183 = vmatpush3.bf16.msra.mxu0 %v3182_v24  ;;  %v3311_v24 = vld [vmem:[%s4404_s3 + $0x180] ss:$8 sps:$4 sm:$0xff]  }
 0x3a9   : > { %3080 = vmatprep.subr.mxu0 %v3500_v7 }
 0x3ab   : > { %3078 = vmatmul.mubr.msk.f32.vlgmr.msra.gmra.mrb[6].mxu0 %vm865_vm3, %v1607_v25  ;;  %v3314_v25 = vld [vmem:[%s4404_s3 + $0x80] ss:$8 sps:$4 sm:$0xff]  }
 0x3ac   : > { %3082 = vmatprep.mubr.msk.f32.mxu0 %vm3511_vm11, %v3500_v7 }
 0x47e   : > { %v1677_v28 = vpop.f32.mrb[6].mxu0 }
 0x47f   : > { %v1681_v40 = vmax.f32 %v1677_v28, 0.0  ;;  %v3079_v44 = vpop.f32.mrb[7].mxu0  ;;  %v3319_v28 = vld [vmem:[%s4404_s3 + $0x194] ss:$8 sps:$4 sm:$0xff]  }
 0x480   : > { %v3317_v44 = vld [vmem:[%s4404_s3 + $0x190] ss:$8 sps:$4 sm:$0xff]  }
 0x481   : > { %3081 = vmatpush3.msk.msra.mxu0 %vm1687_vm12, %v1681_v40  ;;  %v3322_v40 = vld [vmem:[%s4404_s3 + $0x94] ss:$8 sps:$4 sm:$0xff]  }
 0x482   : > { %3083 = vmatmul.mubr.msk.f32.vlgmr.msra.gmra.mrb[8].mxu0 %vm1683_vm13, %v1682_v45  ;;  %2916 = vmatprep.subr.msk.mxu0 %vm1687_vm12, %v1784_v52  ;;  %v3320_v45 = vld [vmem:[%s4404_s3 + $0x90] ss:$8 sps:$4 sm:$0xff]   ;;  %v3337_v52 = vld [vmem:[%s4404_s3 + $0x1c4] ss:$8 sps:$4 sm:$0xff]  }
 0x483   : > { %1861 = vmatprep.mubr.f32.mxu0 %v3500_v7  ;;  %2917 = vmatpush1.msk.msra.mxu0 %vm1687_vm12, %v1776_v43  ;;  %v3334_v43 = vld [vmem:[%s4404_s3 + $0xb4] ss:$8 sps:$4 sm:$0xff]  }
 0x484   : > { %2442 = vmatprep.subr.bf16.mxu0 %v3265_v56  ;;  %v3340_v56 = vld [vmem:[%s4404_s3 + $0xc4] ss:$8 sps:$4 sm:$0xff]  }
 0x555   : > { %v1757_v35 = vpop.f32.mrb[8].mxu0 }
 0x556   : > { %v2915_v34 = vmul.f32 -1.442695, %v1757_v35  ;;  %v3084_v57 = vpop.f32.mrb[9].mxu0  ;;  %v3343_v35 = vld [vmem:[%s4404_s3 + $0x1d4] ss:$8 sps:$4 sm:$0xff]  }
 0x557   : > { %v3346_v57 = vld [vmem:[%s4404_s3 + $0xd4] ss:$8 sps:$4 sm:$0xff]  }
 0x558   : > { %3359 = vpow2.f32 %v2915_v34  ;;  %v3341_v34 = vld [vmem:[%s4404_s3 + $0x1d0] ss:$8 sps:$4 sm:$0xff]  }
 0x562   : > { %v3360_v58 = vpop.eup %3359 }
 0x563   : > { %v1764_v20 = vadd.f32 1.0, %v3360_v58  ;;  %v3344_v58 = vld [vmem:[%s4404_s3 + $0xd0] ss:$8 sps:$4 sm:$0xff]  }
 0x565   : > { %3361 = vrcp.f32 %v1764_v20  ;;  %v3347_v20 = vld [vmem:[%s4404_s3 + $0x1e0] ss:$8 sps:$4 sm:$0xff]  }
 0x56f   : > { %v3362_v62 = vpop.eup %3361 }
 0x570   : > { %2918 = vmatmul.mubr.msk.f32.vlgmr.msra.gmra.mrb[10].mxu0 %vm1683_vm13, %v3362_v62  ;;  %2921 = vmatmul.mubr.msk.f32.vlgmr.msra.gmra.mrb[6].mxu1 %vm1683_vm13, %v3362_v62  ;;  %v3358_v62 = vld [vmem:[%s4404_s3 + $0xf4] ss:$8 sps:$4 sm:$0xff]  }
 0x571   : > { %2443 = vmatpush1.bf16.msra.mxu0 %v3263_v59  ;;  %2402 = vmatpush1.bf16.msra.mxu1 %v3266_v60  ;;  %v3349_v59 = vld [vmem:[%s4404_s3 + $0x1e4] ss:$8 sps:$4 sm:$0xff]   ;;  %v3350_v60 = vld [vmem:[%s4404_s3 + $0xe0] ss:$8 sps:$4 sm:$0xff]  }
 0x572   : > { %2444 = vmatprep.subr.bf16.mxu0 %v3271_v17  ;;  %2403 = vmatprep.subr.bf16.mxu1 %v3274_v61  ;;  %v3352_v17 = vld [vmem:[%s4404_s3 + $0xe4] ss:$8 sps:$4 sm:$0xff]   ;;  %v3355_v61 = vld [vmem:[%s4404_s3 + $0x1f4] ss:$8 sps:$4 sm:$0xff]  }
 0x575   : > { %2445 = vmatpush1.bf16.msra.mxu0 %v3269_v63  ;;  %2404 = vmatpush1.bf16.msra.mxu1 %v3272_v18  ;;  %v3353_v63 = vld [vmem:[%s4404_s3 + $0x1f0] ss:$8 sps:$4 sm:$0xff]  }
 0x576   : > { %2446 = vmatprep.subr.bf16.mxu0 %v3277_v0  ;;  %2405 = vmatprep.subr.bf16.mxu1 %v3280_v1  ;;  %v3356_v18 = vld [vmem:[%s4404_s3 + $0xf0] ss:$8 sps:$4 sm:$0xff]  }
 0x579   : > { %2447 = vmatpush1.bf16.msra.mxu0 %v3275_v31  ;;  %2406 = vmatpush1.bf16.msra.mxu1 %v3278_v50 }
 0x57a   : > { %2448 = vmatprep.subr.bf16.mxu0 %v3283_v51  ;;  %2407 = vmatprep.subr.bf16.mxu1 %v3286_v54 }
 0x57d   : > { %2449 = vmatpush1.bf16.msra.mxu0 %v3281_v2  ;;  %2408 = vmatpush1.bf16.msra.mxu1 %v3284_v3 }
 0x57e   : > { %2450 = vmatprep.subr.bf16.mxu0 %v3289_v4  ;;  %2409 = vmatprep.subr.bf16.mxu1 %v3292_v8 }
 0x581   : > { %2451 = vmatpush1.bf16.msra.mxu0 %v3287_v42  ;;  %2410 = vmatpush1.bf16.msra.mxu1 %v3290_v55 }
 0x582   : > { %2452 = vmatprep.subr.bf16.mxu0 %v3295_v41  ;;  %2411 = vmatprep.subr.bf16.mxu1 %v3298_v38 }
 0x585   : > { %2453 = vmatpush1.bf16.msra.mxu0 %v3293_v12  ;;  %2412 = vmatpush1.bf16.msra.mxu1 %v3296_v39 }
 0x586   : > { %2454 = vmatprep.subr.bf16.mxu0 %v3301_v13  ;;  %2413 = vmatprep.subr.bf16.mxu1 %v3304_v33 }
 0x589   : > { %2455 = vmatpush1.bf16.msra.mxu0 %v3299_v15  ;;  %2414 = vmatpush1.bf16.msra.mxu1 %v3302_v16 }
 0x58a   : > { %2456 = vmatprep.subr.bf16.mxu0 %v3307_v30  ;;  %2415 = vmatprep.subr.bf16.mxu1 %v3310_v14 }
 0x58d   : > { %2457 = vmatpush1.bf16.msra.mxu0 %v3305_v19  ;;  %2416 = vmatpush1.bf16.msra.mxu1 %v3308_v29 }
 0x58e   : > { %2458 = vmatprep.subr.bf16.mxu0 %v3313_v21  ;;  %2417 = vmatprep.subr.bf16.mxu1 %v3316_v23 }
 0x591   : > { %2459 = vmatpush1.bf16.msra.mxu0 %v3311_v24  ;;  %2418 = vmatpush1.bf16.msra.mxu1 %v3314_v25 }
 0x592   : > { %2460 = vmatprep.subr.bf16.mxu0 %v3319_v28  ;;  %2419 = vmatprep.subr.bf16.mxu1 %v3322_v40 }
 0x595   : > { %2461 = vmatpush1.bf16.msra.mxu0 %v3317_v44  ;;  %2420 = vmatpush1.bf16.msra.mxu1 %v3320_v45 }
 0x596   : > { %2462 = vmatprep.subr.bf16.mxu0 %v3325_v36  ;;  %2421 = vmatprep.subr.bf16.mxu1 %v3328_v47 }
 0x599   : > { %2463 = vmatpush1.bf16.msra.mxu0 %v3323_v46  ;;  %2422 = vmatpush1.bf16.msra.mxu1 %v3326_v48 }
 0x59a   : > { %2464 = vmatprep.subr.bf16.mxu0 %v3331_v26  ;;  %2423 = vmatprep.subr.bf16.mxu1 %v3334_v43 }
 0x59d   : > { %2465 = vmatpush1.bf16.msra.mxu0 %v3329_v32  ;;  %2424 = vmatpush1.bf16.msra.mxu1 %v3332_v49 }
 0x59e   : > { %2466 = vmatprep.subr.bf16.mxu0 %v3337_v52  ;;  %2425 = vmatprep.subr.bf16.mxu1 %v3340_v56 }
 0x5a1   : > { %2467 = vmatpush1.bf16.msra.mxu0 %v3335_v53  ;;  %2426 = vmatpush1.bf16.msra.mxu1 %v3338_v22 }
 0x5a2   : > { %2468 = vmatprep.subr.bf16.mxu0 %v3343_v35  ;;  %2427 = vmatprep.subr.bf16.mxu1 %v3346_v57 }
 0x5a5   : > { %2469 = vmatpush1.bf16.msra.mxu0 %v3341_v34  ;;  %2428 = vmatpush1.bf16.msra.mxu1 %v3344_v58 }
 0x5a6   : > { %2470 = vmatprep.subr.bf16.mxu0 %v3349_v59  ;;  %2429 = vmatprep.subr.bf16.mxu1 %v3352_v17 }
 0x5a9   : > { %2471 = vmatpush1.bf16.msra.mxu0 %v3347_v20  ;;  %2430 = vmatpush1.bf16.msra.mxu1 %v3350_v60 }
 0x5aa   : > { %2472 = vmatprep.subr.bf16.mxu0 %v3355_v61  ;;  %2431 = vmatprep.subr.bf16.mxu1 %v3358_v62 }
 0x5ad   : > { %2473 = vmatpush1.bf16.msra.mxu0 %v3353_v63  ;;  %2432 = vmatpush1.bf16.msra.mxu1 %v3356_v18 }
 0x643   : > { %v1863_v0 = vpop.f32.mrb[10].mxu0  ;;  %v1934_v1 = vpop.f32.mrb[6].mxu1 }
 0x644   : > { %v4280_v31 = vmul.f32 %v1863_v0, %v4171_v9  ;;  %v4283_v50 = vmul.f32 %v1934_v1, %v4173_v10  ;;  %v1865_v51 = vpop.f32.mrb[11].mxu0  ;;  %v1936_v54 = vpop.f32.mrb[7].mxu1 }
 0x645   : > { %v4286_v2 = vmul.f32 %v1865_v51, %v4175_v11  ;;  %v4289_v3 = vmul.f32 %v1936_v54, %v4177_v27 }
 0x646   : > { %v1943_v4 = vrot.slane %v4280_v31, 4  ;;  %v1955_v8 = vrot.slane %v4283_v50, 4 }
 0x647   : > { %v1949_v42 = vrot.slane %v4286_v2, 4  ;;  %v1961_v9 = vrot.slane %v4289_v3, 4 }
 0x648   : > { %v1944_v55 = vadd.f32 %v1943_v4, %v4280_v31  ;;  %v1973_v10 = vmax.f32 %v4280_v31, %v1943_v4  ;;  %v1956_v41 = vadd.f32 %v1955_v8, %v4283_v50  ;;  %v1985_v11 = vmax.f32 %v4283_v50, %v1955_v8 }
 0x649   : > { %v1950_v38 = vadd.f32 %v1949_v42, %v4286_v2  ;;  %v1979_v27 = vmax.f32 %v4286_v2, %v1949_v42  ;;  %v1962_v12 = vadd.f32 %v1961_v9, %v4289_v3  ;;  %v1991_v39 = vmax.f32 %v4289_v3, %v1961_v9 }
 0x64a   : > { %v1945_v13 = vrot.slane %v1944_v55, 2  ;;  %v1974_v33 = vrot.slane %v1973_v10, 2  ;;  %v1957_v15 = vrot.slane %v1956_v41, 2  ;;  %v1986_v16 = vrot.slane %v1985_v11, 2 }
 0x64b   : > { %v1951_v30 = vrot.slane %v1950_v38, 2  ;;  %v1980_v14 = vrot.slane %v1979_v27, 2  ;;  %v1963_v19 = vrot.slane %v1962_v12, 2  ;;  %v1992_v29 = vrot.slane %v1991_v39, 2 }
 0x64c   : > { %v1946_v21 = vadd.f32 %v1945_v13, %v1944_v55  ;;  %v1975_v23 = vmax.f32 %v1973_v10, %v1974_v33  ;;  %v1958_v24 = vadd.f32 %v1957_v15, %v1956_v41  ;;  %v1987_v25 = vmax.f32 %v1985_v11, %v1986_v16 }
 0x64d   : > { %v1952_v28 = vadd.f32 %v1951_v30, %v1950_v38  ;;  %v1981_v40 = vmax.f32 %v1979_v27, %v1980_v14  ;;  %v1964_v44 = vadd.f32 %v1963_v19, %v1962_v12  ;;  %v1993_v45 = vmax.f32 %v1991_v39, %v1992_v29 }
 0x64e   : > { %v1947_v36 = vrot.slane %v1946_v21, 1  ;;  %v1976_v46 = vrot.slane %v1975_v23, 1  ;;  %v1959_v47 = vrot.slane %v1958_v24, 1  ;;  %v1988_v48 = vrot.slane %v1987_v25, 1 }
 0x64f   : > { %v1982_v26 = vrot.slane %v1981_v40, 1  ;;  %v1994_v32 = vrot.slane %v1993_v45, 1  ;;  %v1953_v43 = vrot.slane %v1952_v28, 1  ;;  %v1965_v49 = vrot.slane %v1964_v44, 1 }
 0x650   : > { %v1948_v52 = vadd.f32 %v1947_v36, %v1946_v21  ;;  %v1960_v53 = vadd.f32 %v1959_v47, %v1958_v24  ;;  %v1989_v56 = vmax.f32 %v1987_v25, %v1988_v48  ;;  %v1977_v57 = vmax.f32 %v1975_v23, %v1976_v46 }
 0x651   : > { %v1995_v22 = vmax.f32 %v1993_v45, %v1994_v32  ;;  %v1954_v35 = vadd.f32 %v1953_v43, %v1952_v28  ;;  %v1966_v34 = vadd.f32 %v1965_v49, %v1964_v44  ;;  %v1983_v59 = vmax.f32 %v1981_v40, %v1982_v26 }
 0x652   : > { %v2002_v58 = vrot.slane %v1989_v56, 7  ;;  %v1970_v20 = vmul.f32 0.125, %v1960_v53  ;;  %v1968_v62 = vmul.f32 0.125, %v1948_v52  ;;  %v2491_v11 = vstv %s2490_s24 }
 0x653   : > { %v2003_v60 = vrot.slane %v1995_v22, 7  ;;  %v1971_v17 = vmul.f32 0.125, %v1966_v34  ;;  %v1969_v0 = vmul.f32 0.125, %v1954_v35 }
 0x654   : > { %v2011_v61 = vsel %vm2008_vm14, %v1977_v57, %v2002_v58  ;;  %v2000_v63 = vrot.slane %v1970_v20, 7  ;;  %v2540_v58 = vld [vmem:[%s3745_s5] sm:$0xf]  ;;  %s3513_s5 = smov [#allocation8]  }
 0x655   : > { %v2012_v18 = vsel %vm2008_vm14, %v1983_v59, %v2003_v60  ;;  %v2001_v1 = vrot.slane %v1971_v17, 7  ;;  %v2015_v4 = vpack.c.bf16 %v2011_v61, %v2011_v61  ;;  %v2545_v60 = vpop.permute.xlu0 %2544  ;;  %s2720_s22 = sshll.u32 %s3513_s5, 4  ;;  %s2721_s22 = int_to_ptr.vmem [resolvable:$true] %s2720_s22 }
 0x656   : > { %v2016_v51 = vpack.c.bf16 %v2012_v18, %v2012_v18  ;;  %v2009_v54 = vsel %vm2008_vm14, %v1968_v62, %v2000_v63  ;;  %s3426_s21 = scalar_lea.vmem %s2721_s22, 256  ;;  %p3433_p4 = scmp.lt.s32.totalorder %s2721_s22, %s2721_s22 }
 0x657   : > { %v2010_v8 = vsel %vm2008_vm14, %v1969_v0, %v2001_v1  ;;  %v2013_v9 = vpack.c.bf16 %v2009_v54, %v2009_v54  ;;  %v3380_v54 = vld [vmem:[#allocation8 + $0x8] sm:$0xff]  ;;  %p3427_p6 = scmp.ne.s32.totalorder %s2721_s22, %s3426_s21  ;;  %p3434_p9 = scmp.lt.s32.totalorder %s3426_s21, %s3426_s21 }
 0x658   : > { %2474 = vmatprep.mubr.bf16.mxu0 %v2016_v51  ;;  %v2014_v42 = vpack.c.bf16 %v2010_v8, %v2010_v8 }
 0x659   : > { %2475 = vmatmul.mubr.bf16.vlgmr.msra.gmra.mrb[12].mxu0 %v2015_v4  ;;  %p3428_p7 = pnand %p3427_p6, %p3207_p3  ;;  %p3435_p13 = por %p3434_p9, %p3433_p4 }
 0x65a   : > { %2433 = vmatprep.mubr.bf16.mxu1 %v2014_v42 }
 0x65b   : > { %2434 = vmatmul.mubr.bf16.vlgmr.msra.gmra.mrb[8].mxu1 %v2013_v9  ;;  %p3429_p11 = pneg %p3428_p7 }
 0x65c   : > { %2615 = vmatprep.mubr.f32.mxu1 %v3500_v7 }
 0x65d   : > { %p3436_p1 = pnand %p3435_p13, %p3429_p11 }
 0x72c   : > { %v2476_v55 = vpop.f32.mrb[12].mxu0 }
 0x72d   : > { %v2478_v10 = vpop.f32.mrb[13].mxu0 }
 0x72e   : > { %v2435_v41 = vpop.f32.mrb[8].mxu1  ;;  %v2480_v38 = vpop.f32.mrb[14].mxu0 }
 0x72f   : > { %v2477_v27 = vadd.f32 %v2476_v55, %v2435_v41  ;;  %v2437_v12 = vpop.f32.mrb[9].mxu1  ;;  %v2481_v39 = vpop.f32.mrb[15].mxu0 }
 0x730   : > { %v2479_v13 = vadd.f32 %v2478_v10, %v2437_v12  ;;  %v2439_v33 = vpop.f32.mrb[10].mxu1 }
 0x731   : > { %v2485_v15 = vrot.slane %v2477_v27, 1  ;;  %v2492_v16 = vadd.f32 %v2491_v11, %v2477_v27  ;;  %v2440_v30 = vpop.f32.mrb[11].mxu1 }
 0x732   : > { %v2486_v14 = vrot.slane %v2479_v13, 1  ;;  %v2493_v19 = vadd.f32 %v2491_v11, %v2479_v13 }
 0x733   : > { %v2494_v29 = vadd.f32 %v2491_v11, %v2485_v15  ;;  %v2987_v21 = vmul.f32 -1.442695, %v2492_v16 }
 0x734   : > { %v2495_v23 = vadd.f32 %v2491_v11, %v2486_v14  ;;  %v2988_v24 = vmul.f32 -1.442695, %v2493_v19 }
 0x735   : > { %3363 = vpow2.f32 %v2987_v21  ;;  %v2989_v25 = vmul.f32 -1.442695, %v2494_v29 }
 0x736   : > { %3365 = vpow2.f32 %v2988_v24  ;;  %v2990_v28 = vmul.f32 -1.442695, %v2495_v23 }
 0x737   : > { %3367 = vpow2.f32 %v2989_v25 }
 0x738   : > { %3369 = vpow2.f32 %v2990_v28 }
 0x73f   : > { %v3364_v40 = vpop.eup %3363 }
 0x740   : > { %v3366_v44 = vpop.eup %3365  ;;  %v2508_v45 = vadd.f32 1.0, %v3364_v40 }
 0x741   : > { %v3368_v36 = vpop.eup %3367  ;;  %v2509_v46 = vadd.f32 1.0, %v3366_v44 }
 0x742   : > { %v3370_v47 = vpop.eup %3369  ;;  %v2510_v48 = vadd.f32 1.0, %v3368_v36  ;;  %3371 = vrcp.f32 %v2508_v45 }
 0x743   : > { %v2511_v26 = vadd.f32 1.0, %v3370_v47  ;;  %3373 = vrcp.f32 %v2509_v46 }
 0x744   : > { %3375 = vrcp.f32 %v2510_v48 }
 0x745   : > { %3377 = vrcp.f32 %v2511_v26 }
 0x74c   : > { %v3372_v32 = vpop.eup %3371 }
 0x74d   : > { %v3374_v43 = vpop.eup %3373  ;;  %v2523_v49 = vrot.slane %v3372_v32, %v3836_v37 }
 0x74e   : > { %v3376_v52 = vpop.eup %3375  ;;  %v2527_v53 = vrot.slane %v3374_v43, %v3836_v37 }
 0x74f   : > { %v3378_v56 = vpop.eup %3377  ;;  %v2531_v22 = vrot.slane %v3376_v52, %v3836_v37  ;;  %v2536_v57 = vmul.f32 %v2523_v49, %v4280_v31  ;;  %v3379_v31 = vld [vmem:[#allocation8] sm:$0xff] }
 0x750   : > { %v2537_v35 = vmul.f32 %v2527_v53, %v4286_v2  ;;  %v2535_v34 = vrot.slane %v3378_v56, %v3836_v37 }
 0x751   : > { %v2538_v59 = vmul.f32 %v2531_v22, %v4283_v50 }
 0x752   : > { %2551 = vmatprep.subr.mxu1 %v2537_v35  ;;  %v2539_v20 = vmul.f32 %v2535_v34, %v4289_v3 }
 0x753   : > { %2552 = vmatpush1.msra.mxu1 %v2536_v57 }
 0x754   : > { %2991 = vmatmul.mubr.msk.f32.vlgmr.msra.gmra.mrb[12].mxu1 %vm2547_vm15, %v2540_v58  ;;  %2622 = vmatprep.subr.mxu1 %v2539_v20 }
 0x755   : > { %2623 = vmatpush1.msra.mxu1 %v2538_v59  ;;  %2686 = vmatprep.mubr.f32.mxu1 %v3500_v7 }
 0x758   : > { %2992 = vmatmul.mubr.msk.f32.vlgmr.msra.gmra.mrb[14].mxu1 %vm2547_vm15, %v2540_v58 }
 0x827   : > { %v2617_v2 = vpop.f32.mrb[12].mxu1 }
 0x828   : > { %v2618_v17 = vadd.f32 %v2617_v2, %v2545_v60  ;;  %v2619_v37 = vpop.f32.mrb[13].mxu1 }
 0x829   : > { %v2620_v61 = vadd.f32 %v2619_v37, %v2545_v60 }
 0x82a   : > { %v2695_v62 = vadd.f32 %v3379_v31, %v2618_v17 }
 0x82b   : > { %v2696_v63 = vadd.f32 %v2620_v61, %v3760_v5  ;;  %v2688_v3 = vpop.f32.mrb[14].mxu1 }
 0x82c   : > { %v2699_v18 = vmax.f32 %v2695_v62, 0.0  ;;  %v2689_v0 = vadd.f32 %v2688_v3, %v2545_v60  ;;  %v2690_v50 = vpop.f32.mrb[15].mxu1 }
 0x82d   : > { %v2700_v1 = vmax.f32 %v2696_v63, 0.0  ;;  %v2691_v51 = vadd.f32 %v2690_v50, %v2545_v60 }
 0x82e   : > { %v2697_v7 = vadd.f32 %v3380_v54, %v2689_v0 }
 0x82f   : > { %v2707_v4 = vcombine.low %v2699_v18, %v2700_v1  ;;  %v2698_v8 = vadd.f32 %v2691_v51, %v3762_v6 }
 0x830   : > { %v2701_v42 = vmax.f32 %v2697_v7, 0.0 }
 0x831   : > { %2711 = vst [vmem:[#allocation8] sm:$0xff] %v2707_v4  ;;  %v2702_v9 = vmax.f32 %v2698_v8, 0.0 }
 0x833   : > { %v2708_v5 = vcombine.low %v2701_v42, %v2702_v9 }
 0x835   : > { %2712 = vst [vmem:[#allocation8 + $0x8] sm:$0xff] %v2708_v5 }
 0x836   : > { %3439 = shalt.err (!%p3436_p1)
}
 0x837   : > { %s4406_s20 = sld [smem:[#allocation22_spill]] }
 0x83d   : > { %s3440_s25 = scalar_lea.hbm %s4406_s20, 256 }
 0x83e   : > { %p3441_p2 = scmp.ne.s32.totalorder %s4406_s20, %s3440_s25  ;;  %p3446_p0 = scmp.lt.u32.totalorder %s3440_s25, %s4406_s20 }
 0x840   : > { %p3442_p5 = pnand %p3441_p2, %p3207_p3 }
 0x842   : > { %p3443_p8 = pneg %p3442_p5 }
 0x844   : > { %p3448_p10 = pnand %p3446_p0, %p3443_p8 }
 0x846   : > { %3451 = shalt.err (!%p3448_p10)
}
 0x847   : > { %3193 = dma.vmem_to_hbm [thread:$0]  (%p3207_p3), %s2721_s22, 256, %s4406_s20, [#allocation5]  }
 0x848   : > { %3477 = dma.done.wait (%p3207_p3), [#allocation5], 256  }
 0x849   : > { %3479 = vsyncadd (%p3207_p3), [#allocation5], 4294967040 }
 0x84a PF: > { %s4407_s16 = sld [smem:[#allocation14_spill]]  ;;  %s4408_s29 = sld [smem:[#allocation12_spill]] }
 0x84b   : > { %s4409_s30 = sld [smem:[#allocation13_spill]]  ;;  %s4410_s15 = sld [smem:[#allocation15_spill]] }
 0x850   : > { %p26_p12 = scmp.ge.s32.totalorder %s4407_s16, 4  }
 0x852   :  { %28 = sbr.rel (!%p26_p12) target bundleno = 12 (0xc), region = 153 }
 0x859   :  { %2733 = vsyncpa [#allocation4], 1 }
 0x85a   :  { %2735 = vsyncpa [#allocation4 + $0x1], 1 }
 0x85b   :  { %2736 = vsyncpa [#allocation5], 1 }
 0x85c   :  { %2738 = vsyncpa [#allocation5 + $0x1], 1 }
 0x85d   :  { %2739 = vsyncpa [#allocation6], 1 }
 0x85e   :  { %2741 = vsyncpa [#allocation6 + $0x1], 1 }

</bundles_post_ra>
